<compile_context>
chip_gen: v5e
topology: v5e:2x2
jax: 0.10.0
libtpu: 0.0.40
codegen_flags: <defaults>
</compile_context>

<pallas_src>
import functools

import numpy as np
import jax
import jax.numpy as jnp
from jax.experimental import pallas as pl
from jax.experimental.pallas import tpu as pltpu

LANE = 128  # every per-head / per-gate / classifier segment is padded to this


# ----------------------------------------------------------------------------
# Reference helpers (parameter construction)
# ----------------------------------------------------------------------------
def position_encoding_init(position_num, pos_vec_dim):
    """Sinusoid position encoding table (matches the PyTorch reference)."""
    pe = np.array(
        [[pos / np.power(10000, 2 * (j // 2) / pos_vec_dim) for j in range(pos_vec_dim)]
         if pos != 0 else np.zeros(pos_vec_dim)
         for pos in range(position_num)]
    )
    pe[1:, 0::2] = np.sin(pe[1:, 0::2])
    pe[1:, 1::2] = np.cos(pe[1:, 1::2])
    return jnp.asarray(pe, dtype=jnp.float32)


def xavier_normal(key, shape):
    fan_in, fan_out = shape[-2], shape[-1]
    std = np.sqrt(2.0 / (fan_in + fan_out))
    return (jax.random.normal(key, shape, jnp.float32) * std).astype(jnp.float32)


# ----------------------------------------------------------------------------
# In-kernel helpers
# ----------------------------------------------------------------------------
def _sigmoid(x):
    # written via exp to stay on well-supported Mosaic lowerings
    return 1.0 / (1.0 + jnp.exp(-x))


def _layer_norm(z, a, b, eps=1e-3):
    """Reference LayerNormalization: (z-mu)/(std_unbiased+eps)*a + b.

    One-pass statistics: mean and E[z^2] are independent reductions; the
    unbiased (n-1) correction is a scalar factor.
    """
    n = z.shape[-1]
    mu = jnp.mean(z, axis=-1, keepdims=True)
    ex2 = jnp.mean(z * z, axis=-1, keepdims=True)
    var = jnp.maximum(ex2 - mu * mu, 0.0) * (n / (n - 1.0))
    sigma = jnp.sqrt(var)
    return (z - mu) * pl.reciprocal(sigma + eps, approx=True) * a + b


# ----------------------------------------------------------------------------
# Fused Pallas kernel: encoder layers + max-pool + BiLSTM(len=1) + classifier
# ----------------------------------------------------------------------------
def fused_kernel(
        x_ref, mask_ref,
        # stacked per-layer weights (layer axis leading, indexed statically)
        wqkv_ref, wo_ref, bo_ref, ln1a_ref, ln1b_ref,
        w1_ref, b1_ref, w2_ref, b2_ref, ln2a_ref, ln2b_ref,
        # head weights (lane-padded)
        wg_ref, bg_ref, wc1_ref, bc1_ref, wc2_ref, bc2_ref, wc3_ref, bc3_ref,
        # output (lane-dense padded logits)
        out_ref,
        *, L, H, B, S, D, HP):
    x = x_ref[...]                                 # [B*S, D] residual stream
    mask_bias = mask_ref[...]                      # [B, 1, S] additive 0 / -1e9
    scale = 1.0 / float(np.sqrt(D))

    for l in range(L):                             # static unroll over layers
        # --- multi-head attention: one fused QKV matmul, 128-lane padded heads
        qkv = jnp.dot(x, wqkv_ref[l], preferred_element_type=jnp.float32)
        qkv = qkv.reshape(B, S, 3 * H * HP)        # [B, S, 3*H*HP]
        ctx_heads = []
        for h in range(H):                         # tile-aligned lane slices
            q = qkv[:, :, (0 * H + h) * HP:(0 * H + h + 1) * HP]
            k = qkv[:, :, (1 * H + h) * HP:(1 * H + h + 1) * HP]
            v = qkv[:, :, (2 * H + h) * HP:(2 * H + h + 1) * HP]
            s = jnp.einsum('bqd,bkd->bqk', q, k,
                           preferred_element_type=jnp.float32) * scale + mask_bias
            s = s - jnp.max(s, axis=-1, keepdims=True)
            e = jnp.exp(s)
            p = e * pl.reciprocal(jnp.sum(e, axis=-1, keepdims=True), approx=True)
            ctx_heads.append(jnp.einsum('bqk,bkv->bqv', p, v,
                                        preferred_element_type=jnp.float32))
        # lane-aligned concat (128-lane segments) -> one output projection
        ctx = jnp.concatenate(ctx_heads, axis=-1).reshape(B * S, H * HP)
        proj = jnp.dot(ctx, wo_ref[l], preferred_element_type=jnp.float32) + bo_ref[l]
        attn = _layer_norm(proj + x, ln1a_ref[l], ln1b_ref[l])

        # --- position-wise feed-forward (1x1 convs == per-position linears)
        ff = jnp.maximum(
            jnp.dot(attn, w1_ref[l], preferred_element_type=jnp.float32) + b1_ref[l], 0.0)
        ff = jnp.dot(ff, w2_ref[l], preferred_element_type=jnp.float32) + b2_ref[l]
        x = _layer_norm(ff + attn, ln2a_ref[l], ln2b_ref[l])

    # --- head: max-pool over sequence == torch.max(output, 1)[0]
    pooled = jnp.max(x.reshape(B, S, D), axis=1)                  # [B, D]

    # --- single-step BiLSTM (h0 = c0 = 0 -> forget gate dead).
    # All 6 gates (i,g,o for fwd and bwd), each padded to 128 lanes, in ONE matmul.
    gates = jnp.dot(pooled, wg_ref[...], preferred_element_type=jnp.float32) + bg_ref[...]
    i_f = _sigmoid(gates[:, 0 * HP:1 * HP])
    g_f = jnp.tanh(gates[:, 1 * HP:2 * HP])
    o_f = _sigmoid(gates[:, 2 * HP:3 * HP])
    i_b = _sigmoid(gates[:, 3 * HP:4 * HP])
    g_b = jnp.tanh(gates[:, 4 * HP:5 * HP])
    o_b = _sigmoid(gates[:, 5 * HP:6 * HP])
    h_f = o_f * jnp.tanh(i_f * g_f)      # padded lanes: o*tanh(0.5*0) == 0
    h_b = o_b * jnp.tanh(i_b * g_b)

    # --- classifier (lane-dense, 128-padded): Linear -> ReLU -> Linear -> ReLU -> Linear
    h_cat = jnp.concatenate([h_f, h_b], axis=-1)                  # [B, 2*HP]
    z = jnp.maximum(
        jnp.dot(h_cat, wc1_ref[...], preferred_element_type=jnp.float32) + bc1_ref[...], 0.0)
    z = jnp.maximum(
        jnp.dot(z, wc2_ref[...], preferred_element_type=jnp.float32) + bc2_ref[...], 0.0)
    out_ref[...] = jnp.dot(z, wc3_ref[...], preferred_element_type=jnp.float32) + bc3_ref[...]


# ----------------------------------------------------------------------------
# Parameter packing (lane padding, head fusion, layer stacking) -- plain JAX
# ----------------------------------------------------------------------------
def pack_params(params, cfg):
    H, Vd = cfg["head_num"], cfg["v_dim"]
    hid = cfg["sent_hidden_dim"]
    HP = LANE

    def pad_last(a, width):
        return jnp.pad(a, [(0, 0)] * (a.ndim - 1) + [(0, width - a.shape[-1])])

    def pad_rows(a, height):
        return jnp.pad(a, [(0, height - a.shape[0])] + [(0, 0)] * (a.ndim - 1))

    # ---- per-layer weights: fused QKV (each head segment padded to 128 lanes)
    wqkv_l, wo_l = [], []
    for lp in params["layers"]:
        q_blk = jnp.concatenate([pad_last(lp["w_qs"][h], HP) for h in range(H)], axis=-1)
        k_blk = jnp.concatenate([pad_last(lp["w_ks"][h], HP) for h in range(H)], axis=-1)
        v_blk = jnp.concatenate([pad_last(lp["w_vs"][h], HP) for h in range(H)], axis=-1)
        wqkv_l.append(jnp.concatenate([q_blk, k_blk, v_blk], axis=-1))   # [D, 3*H*HP]
        wo3 = lp["w_o"].reshape(H, Vd, -1)                               # [H, Vd, D]
        wo_l.append(jnp.concatenate([pad_rows(wo3[h], HP) for h in range(H)], axis=0))

    stack = lambda key: jnp.stack([lp[key] for lp in params["layers"]], axis=0)
    layer_weights = dict(
        wqkv=jnp.stack(wqkv_l, 0), wo=jnp.stack(wo_l, 0),
        bo=stack("b_o"), ln1a=stack("ln1_a"), ln1b=stack("ln1_b"),
        w1=stack("w1"), b1=stack("b1"), w2=stack("w2"), b2=stack("b2"),
        ln2a=stack("ln2_a"), ln2b=stack("ln2_b"),
    )

    # ---- head weights
    hp = params["head"]

    def gate_pack(w, b):
        # PyTorch LSTM gate order [i, f, g, o]; drop the dead forget gate (c0==0),
        # pad each kept gate to a 128-lane segment.
        ws = [pad_last(w[:, g * hid:(g + 1) * hid], HP) for g in (0, 2, 3)]
        bs = [pad_last(b[:, g * hid:(g + 1) * hid], HP) for g in (0, 2, 3)]
        return jnp.concatenate(ws, -1), jnp.concatenate(bs, -1)

    wgf, bgf = gate_pack(hp["w_ih_f"], hp["b_f"])
    wgb, bgb = gate_pack(hp["w_ih_b"], hp["b_b"])

    wc1 = hp["wc1"]
    wc1f = pad_last(pad_rows(wc1[:hid], HP), HP)
    wc1b = pad_last(pad_rows(wc1[hid:], HP), HP)

    head_weights = dict(
        wg=jnp.concatenate([wgf, wgb], -1),       # [D, 6*HP]
        bg=jnp.concatenate([bgf, bgb], -1),       # [1, 6*HP]
        wc1=jnp.concatenate([wc1f, wc1b], 0),     # [2*HP, HP]
        bc1=pad_last(hp["bc1"], HP),
        wc2=pad_last(pad_rows(hp["wc2"], HP), HP),
        bc2=pad_last(hp["bc2"], HP),
        wc3=pad_last(pad_rows(hp["wc3"], HP), HP),
        bc3=pad_last(hp["bc3"], HP),
    )
    return layer_weights, head_weights


# ----------------------------------------------------------------------------
# Pallas wrapper
# ----------------------------------------------------------------------------
def fused_forward(x2d, mask_bias, lw, hw, cfg, *, B, S):
    D = cfg["model_dim"]
    L = cfg["layer_num"]
    H = cfg["head_num"]
    tags = cfg["tagset_size"]

    layer_keys = ["wqkv", "wo", "bo", "ln1a", "ln1b",
                  "w1", "b1", "w2", "b2", "ln2a", "ln2b"]
    head_keys = ["wg", "bg", "wc1", "bc1", "wc2", "bc2", "wc3", "bc3"]
    args = [x2d, mask_bias] + [lw[k] for k in layer_keys] + [hw[k] for k in head_keys]

    kernel = functools.partial(fused_kernel, L=L, H=H, B=B, S=S, D=D, HP=LANE)

    out_padded = pl.pallas_call(
        kernel,
        out_shape=jax.ShapeDtypeStruct((B, LANE), jnp.float32),
        # grid=() : single invocation, everything VMEM-resident (tiny weights).
        in_specs=[pl.BlockSpec(memory_space=pltpu.MemorySpace.VMEM) for _ in args],
        out_specs=pl.BlockSpec(memory_space=pltpu.MemorySpace.VMEM),
        compiler_params=pltpu.CompilerParams(vmem_limit_bytes=32 * 1024 * 1024),
    )(*args)
    return out_padded[:, :tags]          # strip lane padding of the logits


def transformer_encoder_bilstm_forward(word_seq, pos_seq, params, cfg):
    # Embedding lookups (gathers) kept in plain JAX glue.
    word_emb = params["word_vec_matrix"][word_seq]           # [B, S, D]
    pos_emb = params["pos_table"][pos_seq]                   # [B, S, D]
    x = (word_emb + pos_emb).astype(jnp.float32)

    B, S = word_seq.shape
    D = cfg["model_dim"]
    # additive attention-padding mask (finite; avoids NaN for all-pad rows)
    mask_bias = jnp.where(word_seq == 0, -1e9, 0.0).astype(jnp.float32).reshape(B, 1, S)

    lw, hw = pack_params(params, cfg)
    return fused_forward(x.reshape(B * S, D), mask_bias, lw, hw, cfg, B=B, S=S)


# ----------------------------------------------------------------------------
# Pure-JAX reference (mirrors the PyTorch module math) -- for verification
# ----------------------------------------------------------------------------
def reference_forward(word_seq, pos_seq, params, cfg):
    D, H = cfg["model_dim"], cfg["head_num"]
    hid = cfg["sent_hidden_dim"]
    x = (params["word_vec_matrix"][word_seq] + params["pos_table"][pos_seq]).astype(jnp.float32)
    mask = (word_seq == 0)[:, None, :]

    def layer_norm(z, a, b, eps=1e-3):
        mu = jnp.mean(z, -1, keepdims=True)
        sigma = jnp.sqrt(jnp.sum((z - mu) ** 2, -1, keepdims=True) / (z.shape[-1] - 1))
        return (z - mu) / (sigma + eps) * a + b

    for lp in params["layers"]:
        heads = []
        for h in range(H):
            q = x @ lp["w_qs"][h]
            k = x @ lp["w_ks"][h]
            v = x @ lp["w_vs"][h]
            s = jnp.einsum('bqd,bkd->bqk', q, k) / jnp.sqrt(jnp.float32(D))
            s = jnp.where(mask, -jnp.inf, s)
            p = jax.nn.softmax(s, axis=-1)
            heads.append(jnp.einsum('bqk,bkd->bqd', p, v))
        ctx = jnp.concatenate(heads, axis=-1)
        attn = layer_norm(ctx @ lp["w_o"] + lp["b_o"] + x, lp["ln1_a"], lp["ln1_b"])
        ff = jax.nn.relu(attn @ lp["w1"] + lp["b1"])
        ff = ff @ lp["w2"] + lp["b2"]
        x = layer_norm(ff + attn, lp["ln2_a"], lp["ln2_b"])

    pooled = jnp.max(x, axis=1)
    hp = params["head"]

    def lstm_dir(w, b):
        g = pooled @ w + b
        i = jax.nn.sigmoid(g[:, 0 * hid:1 * hid])
        gg = jnp.tanh(g[:, 2 * hid:3 * hid])
        o = jax.nn.sigmoid(g[:, 3 * hid:4 * hid])
        return o * jnp.tanh(i * gg)          # c0 = 0

    h_cat = jnp.concatenate([lstm_dir(hp["w_ih_f"], hp["b_f"]),
                             lstm_dir(hp["w_ih_b"], hp["b_b"])], axis=-1)
    z = jax.nn.relu(h_cat @ hp["wc1"] + hp["bc1"])
    z = jax.nn.relu(z @ hp["wc2"] + hp["bc2"])
    return z @ hp["wc3"] + hp["bc3"]


# ----------------------------------------------------------------------------
# Parameter init (deterministic, synthetic)
# ----------------------------------------------------------------------------
def init_params(key, cfg):
    D = cfg["model_dim"]
    Kd, Vd, H = cfg["k_dim"], cfg["v_dim"], cfg["head_num"]
    inner = cfg["inner_hid_dim"]
    hid = cfg["sent_hidden_dim"]
    fc = cfg["sent_fc_dim"]
    tags = cfg["tagset_size"]

    keys = iter(jax.random.split(key, 64))
    nxt = lambda: next(keys)

    layers = []
    for _ in range(cfg["layer_num"]):
        layers.append(dict(
            w_qs=xavier_normal(nxt(), (H, D, Kd)),
            w_ks=xavier_normal(nxt(), (H, D, Kd)),
            w_vs=xavier_normal(nxt(), (H, D, Vd)),
            w_o=xavier_normal(nxt(), (H * Vd, D)),
            b_o=(jax.random.normal(nxt(), (1, D), jnp.float32) * 0.1),
            ln1_a=jnp.ones((1, D), jnp.float32),
            ln1_b=jnp.zeros((1, D), jnp.float32),
            w1=xavier_normal(nxt(), (D, inner)),
            b1=(jax.random.normal(nxt(), (1, inner), jnp.float32) * 0.1),
            w2=xavier_normal(nxt(), (inner, D)),
            b2=(jax.random.normal(nxt(), (1, D), jnp.float32) * 0.1),
            ln2_a=jnp.ones((1, D), jnp.float32),
            ln2_b=jnp.zeros((1, D), jnp.float32),
        ))

    # BiLSTM: only input-to-hidden weights matter for a length-1 sequence
    # (h0 = c0 = 0).  Biases b_ih + b_hh are pre-summed.  Gate order [i,f,g,o].
    head = dict(
        w_ih_f=xavier_normal(nxt(), (D, 4 * hid)),
        b_f=(jax.random.normal(nxt(), (1, 4 * hid), jnp.float32) * 0.1
             + jax.random.normal(nxt(), (1, 4 * hid), jnp.float32) * 0.1),
        w_ih_b=xavier_normal(nxt(), (D, 4 * hid)),
        b_b=(jax.random.normal(nxt(), (1, 4 * hid), jnp.float32) * 0.1
             + jax.random.normal(nxt(), (1, 4 * hid), jnp.float32) * 0.1),
        wc1=xavier_normal(nxt(), (2 * hid, fc)),
        bc1=(jax.random.normal(nxt(), (1, fc), jnp.float32) * 0.1),
        wc2=xavier_normal(nxt(), (fc, fc)),
        bc2=(jax.random.normal(nxt(), (1, fc), jnp.float32) * 0.1),
        wc3=xavier_normal(nxt(), (fc, tags)),
        bc3=(jax.random.normal(nxt(), (1, tags), jnp.float32) * 0.1),
    )

    word_vec_matrix = jax.random.normal(nxt(), (cfg["vocab_size"], D), jnp.float32) * 0.1
    pos_table = position_encoding_init(cfg["sentence_length"] + 1, D)

    return dict(layers=layers, head=head,
                word_vec_matrix=word_vec_matrix, pos_table=pos_table)


# ----------------------------------------------------------------------------
# Main
# ----------------------------------------------------------------------------
if __name__ == "__main__":
    cfg = dict(
        vocab_size=50,
        sentence_length=8,
        layer_num=2,
        head_num=2,
        k_dim=16,
        v_dim=16,
        model_dim=32,        # == word_vec_dim
        inner_hid_dim=64,
        sent_hidden_dim=16,
        sent_fc_dim=32,
        tagset_size=5,
    )
    B, S = 2, cfg["sentence_length"]

    key = jax.random.PRNGKey(0)
    k_params, k_words = jax.random.split(key)

    params = init_params(k_params, cfg)

    word_seq = jax.random.randint(k_words, (B, S), 1, cfg["vocab_size"], dtype=jnp.int32)
    word_seq = word_seq.at[:, -1].set(0)               # one pad token to exercise the mask
    pos_seq = jnp.where(word_seq != 0,
                        jnp.arange(1, S + 1, dtype=jnp.int32)[None, :], 0)

    out = transformer_encoder_bilstm_forward(word_seq, pos_seq, params, cfg)
    out = jax.block_until_ready(out)
    assert out.shape == (B, cfg["tagset_size"])
    assert bool(jnp.all(jnp.isfinite(out)))

    # correctness check against a pure-JAX reference (loose tolerance: the
    # kernel uses approximate EUP reciprocals in softmax / layer-norm).
    ref = jax.block_until_ready(reference_forward(word_seq, pos_seq, params, cfg))
    np.testing.assert_allclose(np.asarray(out), np.asarray(ref), rtol=2e-2, atol=2e-2)

    print("KERNEL_OK")
</pallas_src>

<mosaic_0001>
module attributes {stable_mosaic.version = 11 : i64} {
  func.func @fused_kernel(%arg0: memref<16x32xf32, #tpu.memory_space<vmem>>, %arg1: memref<2x1x8xf32, #tpu.memory_space<vmem>>, %arg2: memref<2x32x768xf32, #tpu.memory_space<vmem>>, %arg3: memref<2x256x32xf32, #tpu.memory_space<vmem>>, %arg4: memref<2x1x32xf32, #tpu.memory_space<vmem>>, %arg5: memref<2x1x32xf32, #tpu.memory_space<vmem>>, %arg6: memref<2x1x32xf32, #tpu.memory_space<vmem>>, %arg7: memref<2x32x64xf32, #tpu.memory_space<vmem>>, %arg8: memref<2x1x64xf32, #tpu.memory_space<vmem>>, %arg9: memref<2x64x32xf32, #tpu.memory_space<vmem>>, %arg10: memref<2x1x32xf32, #tpu.memory_space<vmem>>, %arg11: memref<2x1x32xf32, #tpu.memory_space<vmem>>, %arg12: memref<2x1x32xf32, #tpu.memory_space<vmem>>, %arg13: memref<32x768xf32, #tpu.memory_space<vmem>>, %arg14: memref<1x768xf32, #tpu.memory_space<vmem>>, %arg15: memref<256x128xf32, #tpu.memory_space<vmem>>, %arg16: memref<1x128xf32, #tpu.memory_space<vmem>>, %arg17: memref<128x128xf32, #tpu.memory_space<vmem>>, %arg18: memref<1x128xf32, #tpu.memory_space<vmem>>, %arg19: memref<128x128xf32, #tpu.memory_space<vmem>>, %arg20: memref<1x128xf32, #tpu.memory_space<vmem>>, %arg21: memref<2x128xf32, #tpu.memory_space<vmem>>) attributes {dimension_semantics = [], scalar_prefetch = 0 : i64, scratch_operands = 0 : i64, tpu.core_type = #tpu.core_type<tc>} {
    %c0 = arith.constant 0 : index
    %c0_0 = arith.constant 0 : index
    %0 = vector.load %arg0[%c0, %c0_0] : memref<16x32xf32, #tpu.memory_space<vmem>>, vector<16x32xf32>
    %c0_1 = arith.constant 0 : index
    %c0_2 = arith.constant 0 : index
    %c0_3 = arith.constant 0 : index
    %1 = vector.load %arg1[%c0_1, %c0_2, %c0_3] : memref<2x1x8xf32, #tpu.memory_space<vmem>>, vector<2x1x8xf32>
    %c0_4 = arith.constant 0 : index
    %c0_5 = arith.constant 0 : index
    %c0_6 = arith.constant 0 : index
    %2 = vector.load %arg2[%c0_4, %c0_5, %c0_6] : memref<2x32x768xf32, #tpu.memory_space<vmem>>, vector<1x32x768xf32>
    %3 = vector.shape_cast %2 : vector<1x32x768xf32> to vector<32x768xf32>
    %cst = arith.constant dense<0.000000e+00> : vector<16x768xf32>
    %4 = tpu.matmul %0, %3, %cst {dimension_numbers = #tpu.dot_dimension_numbers<[1], [0], [0], [1], [0, 0, 1, 1], [], []>} : vector<16x32xf32>, vector<32x768xf32>, vector<16x768xf32> -> vector<16x768xf32>
    %5 = vector.shape_cast %4 : vector<16x768xf32> to vector<2x8x768xf32>
    %6 = vector.extract_strided_slice %5 {offsets = [0, 0, 0], sizes = [2, 8, 128], strides = [1, 1, 1]} : vector<2x8x768xf32> to vector<2x8x128xf32>
    %7 = vector.extract_strided_slice %5 {offsets = [0, 0, 256], sizes = [2, 8, 128], strides = [1, 1, 1]} : vector<2x8x768xf32> to vector<2x8x128xf32>
    %8 = vector.extract_strided_slice %5 {offsets = [0, 0, 512], sizes = [2, 8, 128], strides = [1, 1, 1]} : vector<2x8x768xf32> to vector<2x8x128xf32>
    "tpu.trace_start"() <{level = 10 : i32, message = "bqd,bkd->bqk"}> : () -> ()
    %cst_7 = arith.constant dense<0.000000e+00> : vector<2x8x8xf32>
    %9 = tpu.matmul %6, %7, %cst_7 {dimension_numbers = #tpu.dot_dimension_numbers<[2], [2], [1], [1], [0, 0, 0, 1, 1, 1], [0], [0]>} : vector<2x8x128xf32>, vector<2x8x128xf32>, vector<2x8x8xf32> -> vector<2x8x8xf32>
    "tpu.trace_stop"() : () -> ()
    %cst_8 = arith.constant 0.176776692 : f32
    %10 = vector.broadcast %cst_8 : f32 to vector<2x8x8xf32>
    %11 = arith.mulf %9, %10 : vector<2x8x8xf32>
    %12 = vector.broadcast %1 : vector<2x1x8xf32> to vector<2x8x8xf32>
    %13 = arith.addf %11, %12 : vector<2x8x8xf32>
    %cst_9 = arith.constant dense<0xFF800000> : vector<2x8xf32>
    %14 = vector.multi_reduction <maximumf>, %13, %cst_9 [2] : vector<2x8x8xf32> to vector<2x8xf32>
    %15 = vector.shape_cast %14 : vector<2x8xf32> to vector<2x8x1xf32>
    %16 = vector.broadcast %15 : vector<2x8x1xf32> to vector<2x8x8xf32>
    %17 = arith.subf %13, %16 : vector<2x8x8xf32>
    %18 = math.exp %17 : vector<2x8x8xf32>
    %cst_10 = arith.constant dense<0.000000e+00> : vector<2x8xf32>
    %19 = vector.multi_reduction <add>, %18, %cst_10 [2] : vector<2x8x8xf32> to vector<2x8xf32>
    %20 = vector.shape_cast %19 : vector<2x8xf32> to vector<2x8x1xf32>
    %21 = tpu.reciprocal %20 {approx = true} : vector<2x8x1xf32> -> vector<2x8x1xf32>
    %22 = vector.broadcast %21 : vector<2x8x1xf32> to vector<2x8x8xf32>
    %23 = arith.mulf %18, %22 : vector<2x8x8xf32>
    "tpu.trace_start"() <{level = 10 : i32, message = "bqk,bkv->bqv"}> : () -> ()
    %cst_11 = arith.constant dense<0.000000e+00> : vector<2x8x128xf32>
    %24 = tpu.matmul %23, %8, %cst_11 {dimension_numbers = #tpu.dot_dimension_numbers<[2], [1], [1], [2], [0, 0, 0, 1, 1, 2], [0], [0]>} : vector<2x8x8xf32>, vector<2x8x128xf32>, vector<2x8x128xf32> -> vector<2x8x128xf32>
    "tpu.trace_stop"() : () -> ()
    %25 = vector.extract_strided_slice %5 {offsets = [0, 0, 128], sizes = [2, 8, 128], strides = [1, 1, 1]} : vector<2x8x768xf32> to vector<2x8x128xf32>
    %26 = vector.extract_strided_slice %5 {offsets = [0, 0, 384], sizes = [2, 8, 128], strides = [1, 1, 1]} : vector<2x8x768xf32> to vector<2x8x128xf32>
    %27 = vector.extract_strided_slice %5 {offsets = [0, 0, 640], sizes = [2, 8, 128], strides = [1, 1, 1]} : vector<2x8x768xf32> to vector<2x8x128xf32>
    "tpu.trace_start"() <{level = 10 : i32, message = "bqd,bkd->bqk"}> : () -> ()
    %cst_12 = arith.constant dense<0.000000e+00> : vector<2x8x8xf32>
    %28 = tpu.matmul %25, %26, %cst_12 {dimension_numbers = #tpu.dot_dimension_numbers<[2], [2], [1], [1], [0, 0, 0, 1, 1, 1], [0], [0]>} : vector<2x8x128xf32>, vector<2x8x128xf32>, vector<2x8x8xf32> -> vector<2x8x8xf32>
    "tpu.trace_stop"() : () -> ()
    %cst_13 = arith.constant 0.176776692 : f32
    %29 = vector.broadcast %cst_13 : f32 to vector<2x8x8xf32>
    %30 = arith.mulf %28, %29 : vector<2x8x8xf32>
    %31 = vector.broadcast %1 : vector<2x1x8xf32> to vector<2x8x8xf32>
    %32 = arith.addf %30, %31 : vector<2x8x8xf32>
    %cst_14 = arith.constant dense<0xFF800000> : vector<2x8xf32>
    %33 = vector.multi_reduction <maximumf>, %32, %cst_14 [2] : vector<2x8x8xf32> to vector<2x8xf32>
    %34 = vector.shape_cast %33 : vector<2x8xf32> to vector<2x8x1xf32>
    %35 = vector.broadcast %34 : vector<2x8x1xf32> to vector<2x8x8xf32>
    %36 = arith.subf %32, %35 : vector<2x8x8xf32>
    %37 = math.exp %36 : vector<2x8x8xf32>
    %cst_15 = arith.constant dense<0.000000e+00> : vector<2x8xf32>
    %38 = vector.multi_reduction <add>, %37, %cst_15 [2] : vector<2x8x8xf32> to vector<2x8xf32>
    %39 = vector.shape_cast %38 : vector<2x8xf32> to vector<2x8x1xf32>
    %40 = tpu.reciprocal %39 {approx = true} : vector<2x8x1xf32> -> vector<2x8x1xf32>
    %41 = vector.broadcast %40 : vector<2x8x1xf32> to vector<2x8x8xf32>
    %42 = arith.mulf %37, %41 : vector<2x8x8xf32>
    "tpu.trace_start"() <{level = 10 : i32, message = "bqk,bkv->bqv"}> : () -> ()
    %cst_16 = arith.constant dense<0.000000e+00> : vector<2x8x128xf32>
    %43 = tpu.matmul %42, %27, %cst_16 {dimension_numbers = #tpu.dot_dimension_numbers<[2], [1], [1], [2], [0, 0, 0, 1, 1, 2], [0], [0]>} : vector<2x8x8xf32>, vector<2x8x128xf32>, vector<2x8x128xf32> -> vector<2x8x128xf32>
    "tpu.trace_stop"() : () -> ()
    %44 = tpu.concatenate %24, %43 in 2 : vector<2x8x128xf32>, vector<2x8x128xf32> -> vector<2x8x256xf32>
    %45 = vector.shape_cast %44 : vector<2x8x256xf32> to vector<16x256xf32>
    %c0_17 = arith.constant 0 : index
    %c0_18 = arith.constant 0 : index
    %c0_19 = arith.constant 0 : index
    %46 = vector.load %arg3[%c0_17, %c0_18, %c0_19] : memref<2x256x32xf32, #tpu.memory_space<vmem>>, vector<1x256x32xf32>
    %47 = vector.shape_cast %46 : vector<1x256x32xf32> to vector<256x32xf32>
    %cst_20 = arith.constant dense<0.000000e+00> : vector<16x32xf32>
    %48 = tpu.matmul %45, %47, %cst_20 {dimension_numbers = #tpu.dot_dimension_numbers<[1], [0], [0], [1], [0, 0, 1, 1], [], []>} : vector<16x256xf32>, vector<256x32xf32>, vector<16x32xf32> -> vector<16x32xf32>
    %c0_21 = arith.constant 0 : index
    %c0_22 = arith.constant 0 : index
    %c0_23 = arith.constant 0 : index
    %49 = vector.load %arg4[%c0_21, %c0_22, %c0_23] : memref<2x1x32xf32, #tpu.memory_space<vmem>>, vector<1x1x32xf32>
    %50 = vector.shape_cast %49 : vector<1x1x32xf32> to vector<1x32xf32>
    %51 = vector.broadcast %50 : vector<1x32xf32> to vector<16x32xf32>
    %52 = arith.addf %48, %51 : vector<16x32xf32>
    %53 = arith.addf %52, %0 : vector<16x32xf32>
    %c0_24 = arith.constant 0 : index
    %c0_25 = arith.constant 0 : index
    %c0_26 = arith.constant 0 : index
    %54 = vector.load %arg5[%c0_24, %c0_25, %c0_26] : memref<2x1x32xf32, #tpu.memory_space<vmem>>, vector<1x1x32xf32>
    %55 = vector.shape_cast %54 : vector<1x1x32xf32> to vector<1x32xf32>
    %c0_27 = arith.constant 0 : index
    %c0_28 = arith.constant 0 : index
    %c0_29 = arith.constant 0 : index
    %56 = vector.load %arg6[%c0_27, %c0_28, %c0_29] : memref<2x1x32xf32, #tpu.memory_space<vmem>>, vector<1x1x32xf32>
    %57 = vector.shape_cast %56 : vector<1x1x32xf32> to vector<1x32xf32>
    %cst_30 = arith.constant dense<0.000000e+00> : vector<16xf32>
    %58 = vector.multi_reduction <add>, %53, %cst_30 [1] : vector<16x32xf32> to vector<16xf32>
    %59 = vector.shape_cast %58 : vector<16xf32> to vector<16x1xf32>
    %cst_31 = arith.constant 3.200000e+01 : f32
    %60 = vector.broadcast %cst_31 : f32 to vector<16x1xf32>
    %61 = arith.divf %59, %60 : vector<16x1xf32>
    %62 = arith.mulf %53, %53 : vector<16x32xf32>
    %cst_32 = arith.constant dense<0.000000e+00> : vector<16xf32>
    %63 = vector.multi_reduction <add>, %62, %cst_32 [1] : vector<16x32xf32> to vector<16xf32>
    %64 = vector.shape_cast %63 : vector<16xf32> to vector<16x1xf32>
    %cst_33 = arith.constant 3.200000e+01 : f32
    %65 = vector.broadcast %cst_33 : f32 to vector<16x1xf32>
    %66 = arith.divf %64, %65 : vector<16x1xf32>
    %67 = arith.mulf %61, %61 : vector<16x1xf32>
    %68 = arith.subf %66, %67 : vector<16x1xf32>
    %cst_34 = arith.constant 0.000000e+00 : f32
    %69 = vector.broadcast %cst_34 : f32 to vector<16x1xf32>
    %70 = arith.maximumf %68, %69 : vector<16x1xf32>
    %cst_35 = arith.constant 1.03225803 : f32
    %71 = vector.broadcast %cst_35 : f32 to vector<16x1xf32>
    %72 = arith.mulf %70, %71 : vector<16x1xf32>
    %73 = math.sqrt %72 : vector<16x1xf32>
    %74 = vector.broadcast %61 : vector<16x1xf32> to vector<16x32xf32>
    %75 = arith.subf %53, %74 : vector<16x32xf32>
    %cst_36 = arith.constant 1.000000e-03 : f32
    %76 = vector.broadcast %cst_36 : f32 to vector<16x1xf32>
    %77 = arith.addf %73, %76 : vector<16x1xf32>
    %78 = tpu.reciprocal %77 {approx = true} : vector<16x1xf32> -> vector<16x1xf32>
    %79 = vector.broadcast %78 : vector<16x1xf32> to vector<16x32xf32>
    %80 = arith.mulf %75, %79 : vector<16x32xf32>
    %81 = vector.broadcast %55 : vector<1x32xf32> to vector<16x32xf32>
    %82 = arith.mulf %80, %81 : vector<16x32xf32>
    %83 = vector.broadcast %57 : vector<1x32xf32> to vector<16x32xf32>
    %84 = arith.addf %82, %83 : vector<16x32xf32>
    %c0_37 = arith.constant 0 : index
    %c0_38 = arith.constant 0 : index
    %c0_39 = arith.constant 0 : index
    %85 = vector.load %arg7[%c0_37, %c0_38, %c0_39] : memref<2x32x64xf32, #tpu.memory_space<vmem>>, vector<1x32x64xf32>
    %86 = vector.shape_cast %85 : vector<1x32x64xf32> to vector<32x64xf32>
    %cst_40 = arith.constant dense<0.000000e+00> : vector<16x64xf32>
    %87 = tpu.matmul %84, %86, %cst_40 {dimension_numbers = #tpu.dot_dimension_numbers<[1], [0], [0], [1], [0, 0, 1, 1], [], []>} : vector<16x32xf32>, vector<32x64xf32>, vector<16x64xf32> -> vector<16x64xf32>
    %c0_41 = arith.constant 0 : index
    %c0_42 = arith.constant 0 : index
    %c0_43 = arith.constant 0 : index
    %88 = vector.load %arg8[%c0_41, %c0_42, %c0_43] : memref<2x1x64xf32, #tpu.memory_space<vmem>>, vector<1x1x64xf32>
    %89 = vector.shape_cast %88 : vector<1x1x64xf32> to vector<1x64xf32>
    %90 = vector.broadcast %89 : vector<1x64xf32> to vector<16x64xf32>
    %91 = arith.addf %87, %90 : vector<16x64xf32>
    %cst_44 = arith.constant 0.000000e+00 : f32
    %92 = vector.broadcast %cst_44 : f32 to vector<16x64xf32>
    %93 = arith.maximumf %91, %92 : vector<16x64xf32>
    %c0_45 = arith.constant 0 : index
    %c0_46 = arith.constant 0 : index
    %c0_47 = arith.constant 0 : index
    %94 = vector.load %arg9[%c0_45, %c0_46, %c0_47] : memref<2x64x32xf32, #tpu.memory_space<vmem>>, vector<1x64x32xf32>
    %95 = vector.shape_cast %94 : vector<1x64x32xf32> to vector<64x32xf32>
    %cst_48 = arith.constant dense<0.000000e+00> : vector<16x32xf32>
    %96 = tpu.matmul %93, %95, %cst_48 {dimension_numbers = #tpu.dot_dimension_numbers<[1], [0], [0], [1], [0, 0, 1, 1], [], []>} : vector<16x64xf32>, vector<64x32xf32>, vector<16x32xf32> -> vector<16x32xf32>
    %c0_49 = arith.constant 0 : index
    %c0_50 = arith.constant 0 : index
    %c0_51 = arith.constant 0 : index
    %97 = vector.load %arg10[%c0_49, %c0_50, %c0_51] : memref<2x1x32xf32, #tpu.memory_space<vmem>>, vector<1x1x32xf32>
    %98 = vector.shape_cast %97 : vector<1x1x32xf32> to vector<1x32xf32>
    %99 = vector.broadcast %98 : vector<1x32xf32> to vector<16x32xf32>
    %100 = arith.addf %96, %99 : vector<16x32xf32>
    %101 = arith.addf %100, %84 : vector<16x32xf32>
    %c0_52 = arith.constant 0 : index
    %c0_53 = arith.constant 0 : index
    %c0_54 = arith.constant 0 : index
    %102 = vector.load %arg11[%c0_52, %c0_53, %c0_54] : memref<2x1x32xf32, #tpu.memory_space<vmem>>, vector<1x1x32xf32>
    %103 = vector.shape_cast %102 : vector<1x1x32xf32> to vector<1x32xf32>
    %c0_55 = arith.constant 0 : index
    %c0_56 = arith.constant 0 : index
    %c0_57 = arith.constant 0 : index
    %104 = vector.load %arg12[%c0_55, %c0_56, %c0_57] : memref<2x1x32xf32, #tpu.memory_space<vmem>>, vector<1x1x32xf32>
    %105 = vector.shape_cast %104 : vector<1x1x32xf32> to vector<1x32xf32>
    %cst_58 = arith.constant dense<0.000000e+00> : vector<16xf32>
    %106 = vector.multi_reduction <add>, %101, %cst_58 [1] : vector<16x32xf32> to vector<16xf32>
    %107 = vector.shape_cast %106 : vector<16xf32> to vector<16x1xf32>
    %cst_59 = arith.constant 3.200000e+01 : f32
    %108 = vector.broadcast %cst_59 : f32 to vector<16x1xf32>
    %109 = arith.divf %107, %108 : vector<16x1xf32>
    %110 = arith.mulf %101, %101 : vector<16x32xf32>
    %cst_60 = arith.constant dense<0.000000e+00> : vector<16xf32>
    %111 = vector.multi_reduction <add>, %110, %cst_60 [1] : vector<16x32xf32> to vector<16xf32>
    %112 = vector.shape_cast %111 : vector<16xf32> to vector<16x1xf32>
    %cst_61 = arith.constant 3.200000e+01 : f32
    %113 = vector.broadcast %cst_61 : f32 to vector<16x1xf32>
    %114 = arith.divf %112, %113 : vector<16x1xf32>
    %115 = arith.mulf %109, %109 : vector<16x1xf32>
    %116 = arith.subf %114, %115 : vector<16x1xf32>
    %cst_62 = arith.constant 0.000000e+00 : f32
    %117 = vector.broadcast %cst_62 : f32 to vector<16x1xf32>
    %118 = arith.maximumf %116, %117 : vector<16x1xf32>
    %cst_63 = arith.constant 1.03225803 : f32
    %119 = vector.broadcast %cst_63 : f32 to vector<16x1xf32>
    %120 = arith.mulf %118, %119 : vector<16x1xf32>
    %121 = math.sqrt %120 : vector<16x1xf32>
    %122 = vector.broadcast %109 : vector<16x1xf32> to vector<16x32xf32>
    %123 = arith.subf %101, %122 : vector<16x32xf32>
    %cst_64 = arith.constant 1.000000e-03 : f32
    %124 = vector.broadcast %cst_64 : f32 to vector<16x1xf32>
    %125 = arith.addf %121, %124 : vector<16x1xf32>
    %126 = tpu.reciprocal %125 {approx = true} : vector<16x1xf32> -> vector<16x1xf32>
    %127 = vector.broadcast %126 : vector<16x1xf32> to vector<16x32xf32>
    %128 = arith.mulf %123, %127 : vector<16x32xf32>
    %129 = vector.broadcast %103 : vector<1x32xf32> to vector<16x32xf32>
    %130 = arith.mulf %128, %129 : vector<16x32xf32>
    %131 = vector.broadcast %105 : vector<1x32xf32> to vector<16x32xf32>
    %132 = arith.addf %130, %131 : vector<16x32xf32>
    %c1 = arith.constant 1 : index
    %c0_65 = arith.constant 0 : index
    %c0_66 = arith.constant 0 : index
    %133 = vector.load %arg2[%c1, %c0_65, %c0_66] : memref<2x32x768xf32, #tpu.memory_space<vmem>>, vector<1x32x768xf32>
    %134 = vector.shape_cast %133 : vector<1x32x768xf32> to vector<32x768xf32>
    %cst_67 = arith.constant dense<0.000000e+00> : vector<16x768xf32>
    %135 = tpu.matmul %132, %134, %cst_67 {dimension_numbers = #tpu.dot_dimension_numbers<[1], [0], [0], [1], [0, 0, 1, 1], [], []>} : vector<16x32xf32>, vector<32x768xf32>, vector<16x768xf32> -> vector<16x768xf32>
    %136 = vector.shape_cast %135 : vector<16x768xf32> to vector<2x8x768xf32>
    %137 = vector.extract_strided_slice %136 {offsets = [0, 0, 0], sizes = [2, 8, 128], strides = [1, 1, 1]} : vector<2x8x768xf32> to vector<2x8x128xf32>
    %138 = vector.extract_strided_slice %136 {offsets = [0, 0, 256], sizes = [2, 8, 128], strides = [1, 1, 1]} : vector<2x8x768xf32> to vector<2x8x128xf32>
    %139 = vector.extract_strided_slice %136 {offsets = [0, 0, 512], sizes = [2, 8, 128], strides = [1, 1, 1]} : vector<2x8x768xf32> to vector<2x8x128xf32>
    "tpu.trace_start"() <{level = 10 : i32, message = "bqd,bkd->bqk"}> : () -> ()
    %cst_68 = arith.constant dense<0.000000e+00> : vector<2x8x8xf32>
    %140 = tpu.matmul %137, %138, %cst_68 {dimension_numbers = #tpu.dot_dimension_numbers<[2], [2], [1], [1], [0, 0, 0, 1, 1, 1], [0], [0]>} : vector<2x8x128xf32>, vector<2x8x128xf32>, vector<2x8x8xf32> -> vector<2x8x8xf32>
    "tpu.trace_stop"() : () -> ()
    %cst_69 = arith.constant 0.176776692 : f32
    %141 = vector.broadcast %cst_69 : f32 to vector<2x8x8xf32>
    %142 = arith.mulf %140, %141 : vector<2x8x8xf32>
    %143 = vector.broadcast %1 : vector<2x1x8xf32> to vector<2x8x8xf32>
    %144 = arith.addf %142, %143 : vector<2x8x8xf32>
    %cst_70 = arith.constant dense<0xFF800000> : vector<2x8xf32>
    %145 = vector.multi_reduction <maximumf>, %144, %cst_70 [2] : vector<2x8x8xf32> to vector<2x8xf32>
    %146 = vector.shape_cast %145 : vector<2x8xf32> to vector<2x8x1xf32>
    %147 = vector.broadcast %146 : vector<2x8x1xf32> to vector<2x8x8xf32>
    %148 = arith.subf %144, %147 : vector<2x8x8xf32>
    %149 = math.exp %148 : vector<2x8x8xf32>
    %cst_71 = arith.constant dense<0.000000e+00> : vector<2x8xf32>
    %150 = vector.multi_reduction <add>, %149, %cst_71 [2] : vector<2x8x8xf32> to vector<2x8xf32>
    %151 = vector.shape_cast %150 : vector<2x8xf32> to vector<2x8x1xf32>
    %152 = tpu.reciprocal %151 {approx = true} : vector<2x8x1xf32> -> vector<2x8x1xf32>
    %153 = vector.broadcast %152 : vector<2x8x1xf32> to vector<2x8x8xf32>
    %154 = arith.mulf %149, %153 : vector<2x8x8xf32>
    "tpu.trace_start"() <{level = 10 : i32, message = "bqk,bkv->bqv"}> : () -> ()
    %cst_72 = arith.constant dense<0.000000e+00> : vector<2x8x128xf32>
    %155 = tpu.matmul %154, %139, %cst_72 {dimension_numbers = #tpu.dot_dimension_numbers<[2], [1], [1], [2], [0, 0, 0, 1, 1, 2], [0], [0]>} : vector<2x8x8xf32>, vector<2x8x128xf32>, vector<2x8x128xf32> -> vector<2x8x128xf32>
    "tpu.trace_stop"() : () -> ()
    %156 = vector.extract_strided_slice %136 {offsets = [0, 0, 128], sizes = [2, 8, 128], strides = [1, 1, 1]} : vector<2x8x768xf32> to vector<2x8x128xf32>
    %157 = vector.extract_strided_slice %136 {offsets = [0, 0, 384], sizes = [2, 8, 128], strides = [1, 1, 1]} : vector<2x8x768xf32> to vector<2x8x128xf32>
    %158 = vector.extract_strided_slice %136 {offsets = [0, 0, 640], sizes = [2, 8, 128], strides = [1, 1, 1]} : vector<2x8x768xf32> to vector<2x8x128xf32>
    "tpu.trace_start"() <{level = 10 : i32, message = "bqd,bkd->bqk"}> : () -> ()
    %cst_73 = arith.constant dense<0.000000e+00> : vector<2x8x8xf32>
    %159 = tpu.matmul %156, %157, %cst_73 {dimension_numbers = #tpu.dot_dimension_numbers<[2], [2], [1], [1], [0, 0, 0, 1, 1, 1], [0], [0]>} : vector<2x8x128xf32>, vector<2x8x128xf32>, vector<2x8x8xf32> -> vector<2x8x8xf32>
    "tpu.trace_stop"() : () -> ()
    %cst_74 = arith.constant 0.176776692 : f32
    %160 = vector.broadcast %cst_74 : f32 to vector<2x8x8xf32>
    %161 = arith.mulf %159, %160 : vector<2x8x8xf32>
    %162 = vector.broadcast %1 : vector<2x1x8xf32> to vector<2x8x8xf32>
    %163 = arith.addf %161, %162 : vector<2x8x8xf32>
    %cst_75 = arith.constant dense<0xFF800000> : vector<2x8xf32>
    %164 = vector.multi_reduction <maximumf>, %163, %cst_75 [2] : vector<2x8x8xf32> to vector<2x8xf32>
    %165 = vector.shape_cast %164 : vector<2x8xf32> to vector<2x8x1xf32>
    %166 = vector.broadcast %165 : vector<2x8x1xf32> to vector<2x8x8xf32>
    %167 = arith.subf %163, %166 : vector<2x8x8xf32>
    %168 = math.exp %167 : vector<2x8x8xf32>
    %cst_76 = arith.constant dense<0.000000e+00> : vector<2x8xf32>
    %169 = vector.multi_reduction <add>, %168, %cst_76 [2] : vector<2x8x8xf32> to vector<2x8xf32>
    %170 = vector.shape_cast %169 : vector<2x8xf32> to vector<2x8x1xf32>
    %171 = tpu.reciprocal %170 {approx = true} : vector<2x8x1xf32> -> vector<2x8x1xf32>
    %172 = vector.broadcast %171 : vector<2x8x1xf32> to vector<2x8x8xf32>
    %173 = arith.mulf %168, %172 : vector<2x8x8xf32>
    "tpu.trace_start"() <{level = 10 : i32, message = "bqk,bkv->bqv"}> : () -> ()
    %cst_77 = arith.constant dense<0.000000e+00> : vector<2x8x128xf32>
    %174 = tpu.matmul %173, %158, %cst_77 {dimension_numbers = #tpu.dot_dimension_numbers<[2], [1], [1], [2], [0, 0, 0, 1, 1, 2], [0], [0]>} : vector<2x8x8xf32>, vector<2x8x128xf32>, vector<2x8x128xf32> -> vector<2x8x128xf32>
    "tpu.trace_stop"() : () -> ()
    %175 = tpu.concatenate %155, %174 in 2 : vector<2x8x128xf32>, vector<2x8x128xf32> -> vector<2x8x256xf32>
    %176 = vector.shape_cast %175 : vector<2x8x256xf32> to vector<16x256xf32>
    %c1_78 = arith.constant 1 : index
    %c0_79 = arith.constant 0 : index
    %c0_80 = arith.constant 0 : index
    %177 = vector.load %arg3[%c1_78, %c0_79, %c0_80] : memref<2x256x32xf32, #tpu.memory_space<vmem>>, vector<1x256x32xf32>
    %178 = vector.shape_cast %177 : vector<1x256x32xf32> to vector<256x32xf32>
    %cst_81 = arith.constant dense<0.000000e+00> : vector<16x32xf32>
    %179 = tpu.matmul %176, %178, %cst_81 {dimension_numbers = #tpu.dot_dimension_numbers<[1], [0], [0], [1], [0, 0, 1, 1], [], []>} : vector<16x256xf32>, vector<256x32xf32>, vector<16x32xf32> -> vector<16x32xf32>
    %c1_82 = arith.constant 1 : index
    %c0_83 = arith.constant 0 : index
    %c0_84 = arith.constant 0 : index
    %180 = vector.load %arg4[%c1_82, %c0_83, %c0_84] : memref<2x1x32xf32, #tpu.memory_space<vmem>>, vector<1x1x32xf32>
    %181 = vector.shape_cast %180 : vector<1x1x32xf32> to vector<1x32xf32>
    %182 = vector.broadcast %181 : vector<1x32xf32> to vector<16x32xf32>
    %183 = arith.addf %179, %182 : vector<16x32xf32>
    %184 = arith.addf %183, %132 : vector<16x32xf32>
    %c1_85 = arith.constant 1 : index
    %c0_86 = arith.constant 0 : index
    %c0_87 = arith.constant 0 : index
    %185 = vector.load %arg5[%c1_85, %c0_86, %c0_87] : memref<2x1x32xf32, #tpu.memory_space<vmem>>, vector<1x1x32xf32>
    %186 = vector.shape_cast %185 : vector<1x1x32xf32> to vector<1x32xf32>
    %c1_88 = arith.constant 1 : index
    %c0_89 = arith.constant 0 : index
    %c0_90 = arith.constant 0 : index
    %187 = vector.load %arg6[%c1_88, %c0_89, %c0_90] : memref<2x1x32xf32, #tpu.memory_space<vmem>>, vector<1x1x32xf32>
    %188 = vector.shape_cast %187 : vector<1x1x32xf32> to vector<1x32xf32>
    %cst_91 = arith.constant dense<0.000000e+00> : vector<16xf32>
    %189 = vector.multi_reduction <add>, %184, %cst_91 [1] : vector<16x32xf32> to vector<16xf32>
    %190 = vector.shape_cast %189 : vector<16xf32> to vector<16x1xf32>
    %cst_92 = arith.constant 3.200000e+01 : f32
    %191 = vector.broadcast %cst_92 : f32 to vector<16x1xf32>
    %192 = arith.divf %190, %191 : vector<16x1xf32>
    %193 = arith.mulf %184, %184 : vector<16x32xf32>
    %cst_93 = arith.constant dense<0.000000e+00> : vector<16xf32>
    %194 = vector.multi_reduction <add>, %193, %cst_93 [1] : vector<16x32xf32> to vector<16xf32>
    %195 = vector.shape_cast %194 : vector<16xf32> to vector<16x1xf32>
    %cst_94 = arith.constant 3.200000e+01 : f32
    %196 = vector.broadcast %cst_94 : f32 to vector<16x1xf32>
    %197 = arith.divf %195, %196 : vector<16x1xf32>
    %198 = arith.mulf %192, %192 : vector<16x1xf32>
    %199 = arith.subf %197, %198 : vector<16x1xf32>
    %cst_95 = arith.constant 0.000000e+00 : f32
    %200 = vector.broadcast %cst_95 : f32 to vector<16x1xf32>
    %201 = arith.maximumf %199, %200 : vector<16x1xf32>
    %cst_96 = arith.constant 1.03225803 : f32
    %202 = vector.broadcast %cst_96 : f32 to vector<16x1xf32>
    %203 = arith.mulf %201, %202 : vector<16x1xf32>
    %204 = math.sqrt %203 : vector<16x1xf32>
    %205 = vector.broadcast %192 : vector<16x1xf32> to vector<16x32xf32>
    %206 = arith.subf %184, %205 : vector<16x32xf32>
    %cst_97 = arith.constant 1.000000e-03 : f32
    %207 = vector.broadcast %cst_97 : f32 to vector<16x1xf32>
    %208 = arith.addf %204, %207 : vector<16x1xf32>
    %209 = tpu.reciprocal %208 {approx = true} : vector<16x1xf32> -> vector<16x1xf32>
    %210 = vector.broadcast %209 : vector<16x1xf32> to vector<16x32xf32>
    %211 = arith.mulf %206, %210 : vector<16x32xf32>
    %212 = vector.broadcast %186 : vector<1x32xf32> to vector<16x32xf32>
    %213 = arith.mulf %211, %212 : vector<16x32xf32>
    %214 = vector.broadcast %188 : vector<1x32xf32> to vector<16x32xf32>
    %215 = arith.addf %213, %214 : vector<16x32xf32>
    %c1_98 = arith.constant 1 : index
    %c0_99 = arith.constant 0 : index
    %c0_100 = arith.constant 0 : index
    %216 = vector.load %arg7[%c1_98, %c0_99, %c0_100] : memref<2x32x64xf32, #tpu.memory_space<vmem>>, vector<1x32x64xf32>
    %217 = vector.shape_cast %216 : vector<1x32x64xf32> to vector<32x64xf32>
    %cst_101 = arith.constant dense<0.000000e+00> : vector<16x64xf32>
    %218 = tpu.matmul %215, %217, %cst_101 {dimension_numbers = #tpu.dot_dimension_numbers<[1], [0], [0], [1], [0, 0, 1, 1], [], []>} : vector<16x32xf32>, vector<32x64xf32>, vector<16x64xf32> -> vector<16x64xf32>
    %c1_102 = arith.constant 1 : index
    %c0_103 = arith.constant 0 : index
    %c0_104 = arith.constant 0 : index
    %219 = vector.load %arg8[%c1_102, %c0_103, %c0_104] : memref<2x1x64xf32, #tpu.memory_space<vmem>>, vector<1x1x64xf32>
    %220 = vector.shape_cast %219 : vector<1x1x64xf32> to vector<1x64xf32>
    %221 = vector.broadcast %220 : vector<1x64xf32> to vector<16x64xf32>
    %222 = arith.addf %218, %221 : vector<16x64xf32>
    %cst_105 = arith.constant 0.000000e+00 : f32
    %223 = vector.broadcast %cst_105 : f32 to vector<16x64xf32>
    %224 = arith.maximumf %222, %223 : vector<16x64xf32>
    %c1_106 = arith.constant 1 : index
    %c0_107 = arith.constant 0 : index
    %c0_108 = arith.constant 0 : index
    %225 = vector.load %arg9[%c1_106, %c0_107, %c0_108] : memref<2x64x32xf32, #tpu.memory_space<vmem>>, vector<1x64x32xf32>
    %226 = vector.shape_cast %225 : vector<1x64x32xf32> to vector<64x32xf32>
    %cst_109 = arith.constant dense<0.000000e+00> : vector<16x32xf32>
    %227 = tpu.matmul %224, %226, %cst_109 {dimension_numbers = #tpu.dot_dimension_numbers<[1], [0], [0], [1], [0, 0, 1, 1], [], []>} : vector<16x64xf32>, vector<64x32xf32>, vector<16x32xf32> -> vector<16x32xf32>
    %c1_110 = arith.constant 1 : index
    %c0_111 = arith.constant 0 : index
    %c0_112 = arith.constant 0 : index
    %228 = vector.load %arg10[%c1_110, %c0_111, %c0_112] : memref<2x1x32xf32, #tpu.memory_space<vmem>>, vector<1x1x32xf32>
    %229 = vector.shape_cast %228 : vector<1x1x32xf32> to vector<1x32xf32>
    %230 = vector.broadcast %229 : vector<1x32xf32> to vector<16x32xf32>
    %231 = arith.addf %227, %230 : vector<16x32xf32>
    %232 = arith.addf %231, %215 : vector<16x32xf32>
    %c1_113 = arith.constant 1 : index
    %c0_114 = arith.constant 0 : index
    %c0_115 = arith.constant 0 : index
    %233 = vector.load %arg11[%c1_113, %c0_114, %c0_115] : memref<2x1x32xf32, #tpu.memory_space<vmem>>, vector<1x1x32xf32>
    %234 = vector.shape_cast %233 : vector<1x1x32xf32> to vector<1x32xf32>
    %c1_116 = arith.constant 1 : index
    %c0_117 = arith.constant 0 : index
    %c0_118 = arith.constant 0 : index
    %235 = vector.load %arg12[%c1_116, %c0_117, %c0_118] : memref<2x1x32xf32, #tpu.memory_space<vmem>>, vector<1x1x32xf32>
    %236 = vector.shape_cast %235 : vector<1x1x32xf32> to vector<1x32xf32>
    %cst_119 = arith.constant dense<0.000000e+00> : vector<16xf32>
    %237 = vector.multi_reduction <add>, %232, %cst_119 [1] : vector<16x32xf32> to vector<16xf32>
    %238 = vector.shape_cast %237 : vector<16xf32> to vector<16x1xf32>
    %cst_120 = arith.constant 3.200000e+01 : f32
    %239 = vector.broadcast %cst_120 : f32 to vector<16x1xf32>
    %240 = arith.divf %238, %239 : vector<16x1xf32>
    %241 = arith.mulf %232, %232 : vector<16x32xf32>
    %cst_121 = arith.constant dense<0.000000e+00> : vector<16xf32>
    %242 = vector.multi_reduction <add>, %241, %cst_121 [1] : vector<16x32xf32> to vector<16xf32>
    %243 = vector.shape_cast %242 : vector<16xf32> to vector<16x1xf32>
    %cst_122 = arith.constant 3.200000e+01 : f32
    %244 = vector.broadcast %cst_122 : f32 to vector<16x1xf32>
    %245 = arith.divf %243, %244 : vector<16x1xf32>
    %246 = arith.mulf %240, %240 : vector<16x1xf32>
    %247 = arith.subf %245, %246 : vector<16x1xf32>
    %cst_123 = arith.constant 0.000000e+00 : f32
    %248 = vector.broadcast %cst_123 : f32 to vector<16x1xf32>
    %249 = arith.maximumf %247, %248 : vector<16x1xf32>
    %cst_124 = arith.constant 1.03225803 : f32
    %250 = vector.broadcast %cst_124 : f32 to vector<16x1xf32>
    %251 = arith.mulf %249, %250 : vector<16x1xf32>
    %252 = math.sqrt %251 : vector<16x1xf32>
    %253 = vector.broadcast %240 : vector<16x1xf32> to vector<16x32xf32>
    %254 = arith.subf %232, %253 : vector<16x32xf32>
    %cst_125 = arith.constant 1.000000e-03 : f32
    %255 = vector.broadcast %cst_125 : f32 to vector<16x1xf32>
    %256 = arith.addf %252, %255 : vector<16x1xf32>
    %257 = tpu.reciprocal %256 {approx = true} : vector<16x1xf32> -> vector<16x1xf32>
    %258 = vector.broadcast %257 : vector<16x1xf32> to vector<16x32xf32>
    %259 = arith.mulf %254, %258 : vector<16x32xf32>
    %260 = vector.broadcast %234 : vector<1x32xf32> to vector<16x32xf32>
    %261 = arith.mulf %259, %260 : vector<16x32xf32>
    %262 = vector.broadcast %236 : vector<1x32xf32> to vector<16x32xf32>
    %263 = arith.addf %261, %262 : vector<16x32xf32>
    %264 = vector.shape_cast %263 : vector<16x32xf32> to vector<2x8x32xf32>
    %cst_126 = arith.constant dense<0xFF800000> : vector<2x32xf32>
    %265 = vector.multi_reduction <maximumf>, %264, %cst_126 [1] : vector<2x8x32xf32> to vector<2x32xf32>
    %c0_127 = arith.constant 0 : index
    %c0_128 = arith.constant 0 : index
    %266 = vector.load %arg13[%c0_127, %c0_128] : memref<32x768xf32, #tpu.memory_space<vmem>>, vector<32x768xf32>
    %cst_129 = arith.constant dense<0.000000e+00> : vector<2x768xf32>
    %267 = tpu.matmul %265, %266, %cst_129 {dimension_numbers = #tpu.dot_dimension_numbers<[1], [0], [0], [1], [0, 0, 1, 1], [], []>} : vector<2x32xf32>, vector<32x768xf32>, vector<2x768xf32> -> vector<2x768xf32>
    %c0_130 = arith.constant 0 : index
    %c0_131 = arith.constant 0 : index
    %268 = vector.load %arg14[%c0_130, %c0_131] : memref<1x768xf32, #tpu.memory_space<vmem>>, vector<1x768xf32>
    %269 = vector.broadcast %268 : vector<1x768xf32> to vector<2x768xf32>
    %270 = arith.addf %267, %269 : vector<2x768xf32>
    %271 = vector.extract_strided_slice %270 {offsets = [0, 0], sizes = [2, 128], strides = [1, 1]} : vector<2x768xf32> to vector<2x128xf32>
    %cst_132 = arith.constant 0.000000e+00 : f32
    %272 = vector.broadcast %cst_132 : f32 to vector<2x128xf32>
    %273 = arith.subf %272, %271 : vector<2x128xf32>
    %274 = math.exp %273 : vector<2x128xf32>
    %cst_133 = arith.constant 1.000000e+00 : f32
    %275 = vector.broadcast %cst_133 : f32 to vector<2x128xf32>
    %276 = arith.addf %275, %274 : vector<2x128xf32>
    %cst_134 = arith.constant 1.000000e+00 : f32
    %277 = vector.broadcast %cst_134 : f32 to vector<2x128xf32>
    %278 = arith.divf %277, %276 : vector<2x128xf32>
    %279 = vector.extract_strided_slice %270 {offsets = [0, 128], sizes = [2, 128], strides = [1, 1]} : vector<2x768xf32> to vector<2x128xf32>
    %280 = math.tanh %279 : vector<2x128xf32>
    %281 = vector.extract_strided_slice %270 {offsets = [0, 256], sizes = [2, 128], strides = [1, 1]} : vector<2x768xf32> to vector<2x128xf32>
    %cst_135 = arith.constant 0.000000e+00 : f32
    %282 = vector.broadcast %cst_135 : f32 to vector<2x128xf32>
    %283 = arith.subf %282, %281 : vector<2x128xf32>
    %284 = math.exp %283 : vector<2x128xf32>
    %cst_136 = arith.constant 1.000000e+00 : f32
    %285 = vector.broadcast %cst_136 : f32 to vector<2x128xf32>
    %286 = arith.addf %285, %284 : vector<2x128xf32>
    %cst_137 = arith.constant 1.000000e+00 : f32
    %287 = vector.broadcast %cst_137 : f32 to vector<2x128xf32>
    %288 = arith.divf %287, %286 : vector<2x128xf32>
    %289 = vector.extract_strided_slice %270 {offsets = [0, 384], sizes = [2, 128], strides = [1, 1]} : vector<2x768xf32> to vector<2x128xf32>
    %cst_138 = arith.constant 0.000000e+00 : f32
    %290 = vector.broadcast %cst_138 : f32 to vector<2x128xf32>
    %291 = arith.subf %290, %289 : vector<2x128xf32>
    %292 = math.exp %291 : vector<2x128xf32>
    %cst_139 = arith.constant 1.000000e+00 : f32
    %293 = vector.broadcast %cst_139 : f32 to vector<2x128xf32>
    %294 = arith.addf %293, %292 : vector<2x128xf32>
    %cst_140 = arith.constant 1.000000e+00 : f32
    %295 = vector.broadcast %cst_140 : f32 to vector<2x128xf32>
    %296 = arith.divf %295, %294 : vector<2x128xf32>
    %297 = vector.extract_strided_slice %270 {offsets = [0, 512], sizes = [2, 128], strides = [1, 1]} : vector<2x768xf32> to vector<2x128xf32>
    %298 = math.tanh %297 : vector<2x128xf32>
    %299 = vector.extract_strided_slice %270 {offsets = [0, 640], sizes = [2, 128], strides = [1, 1]} : vector<2x768xf32> to vector<2x128xf32>
    %cst_141 = arith.constant 0.000000e+00 : f32
    %300 = vector.broadcast %cst_141 : f32 to vector<2x128xf32>
    %301 = arith.subf %300, %299 : vector<2x128xf32>
    %302 = math.exp %301 : vector<2x128xf32>
    %cst_142 = arith.constant 1.000000e+00 : f32
    %303 = vector.broadcast %cst_142 : f32 to vector<2x128xf32>
    %304 = arith.addf %303, %302 : vector<2x128xf32>
    %cst_143 = arith.constant 1.000000e+00 : f32
    %305 = vector.broadcast %cst_143 : f32 to vector<2x128xf32>
    %306 = arith.divf %305, %304 : vector<2x128xf32>
    %307 = arith.mulf %278, %280 : vector<2x128xf32>
    %308 = math.tanh %307 : vector<2x128xf32>
    %309 = arith.mulf %288, %308 : vector<2x128xf32>
    %310 = arith.mulf %296, %298 : vector<2x128xf32>
    %311 = math.tanh %310 : vector<2x128xf32>
    %312 = arith.mulf %306, %311 : vector<2x128xf32>
    %313 = tpu.concatenate %309, %312 in 1 : vector<2x128xf32>, vector<2x128xf32> -> vector<2x256xf32>
    %c0_144 = arith.constant 0 : index
    %c0_145 = arith.constant 0 : index
    %314 = vector.load %arg15[%c0_144, %c0_145] : memref<256x128xf32, #tpu.memory_space<vmem>>, vector<256x128xf32>
    %cst_146 = arith.constant dense<0.000000e+00> : vector<2x128xf32>
    %315 = tpu.matmul %313, %314, %cst_146 {dimension_numbers = #tpu.dot_dimension_numbers<[1], [0], [0], [1], [0, 0, 1, 1], [], []>} : vector<2x256xf32>, vector<256x128xf32>, vector<2x128xf32> -> vector<2x128xf32>
    %c0_147 = arith.constant 0 : index
    %c0_148 = arith.constant 0 : index
    %316 = vector.load %arg16[%c0_147, %c0_148] : memref<1x128xf32, #tpu.memory_space<vmem>>, vector<1x128xf32>
    %317 = vector.broadcast %316 : vector<1x128xf32> to vector<2x128xf32>
    %318 = arith.addf %315, %317 : vector<2x128xf32>
    %cst_149 = arith.constant 0.000000e+00 : f32
    %319 = vector.broadcast %cst_149 : f32 to vector<2x128xf32>
    %320 = arith.maximumf %318, %319 : vector<2x128xf32>
    %c0_150 = arith.constant 0 : index
    %c0_151 = arith.constant 0 : index
    %321 = vector.load %arg17[%c0_150, %c0_151] : memref<128x128xf32, #tpu.memory_space<vmem>>, vector<128x128xf32>
    %cst_152 = arith.constant dense<0.000000e+00> : vector<2x128xf32>
    %322 = tpu.matmul %320, %321, %cst_152 {dimension_numbers = #tpu.dot_dimension_numbers<[1], [0], [0], [1], [0, 0, 1, 1], [], []>} : vector<2x128xf32>, vector<128x128xf32>, vector<2x128xf32> -> vector<2x128xf32>
    %c0_153 = arith.constant 0 : index
    %c0_154 = arith.constant 0 : index
    %323 = vector.load %arg18[%c0_153, %c0_154] : memref<1x128xf32, #tpu.memory_space<vmem>>, vector<1x128xf32>
    %324 = vector.broadcast %323 : vector<1x128xf32> to vector<2x128xf32>
    %325 = arith.addf %322, %324 : vector<2x128xf32>
    %cst_155 = arith.constant 0.000000e+00 : f32
    %326 = vector.broadcast %cst_155 : f32 to vector<2x128xf32>
    %327 = arith.maximumf %325, %326 : vector<2x128xf32>
    %c0_156 = arith.constant 0 : index
    %c0_157 = arith.constant 0 : index
    %328 = vector.load %arg19[%c0_156, %c0_157] : memref<128x128xf32, #tpu.memory_space<vmem>>, vector<128x128xf32>
    %cst_158 = arith.constant dense<0.000000e+00> : vector<2x128xf32>
    %329 = tpu.matmul %327, %328, %cst_158 {dimension_numbers = #tpu.dot_dimension_numbers<[1], [0], [0], [1], [0, 0, 1, 1], [], []>} : vector<2x128xf32>, vector<128x128xf32>, vector<2x128xf32> -> vector<2x128xf32>
    %c0_159 = arith.constant 0 : index
    %c0_160 = arith.constant 0 : index
    %330 = vector.load %arg20[%c0_159, %c0_160] : memref<1x128xf32, #tpu.memory_space<vmem>>, vector<1x128xf32>
    %331 = vector.broadcast %330 : vector<1x128xf32> to vector<2x128xf32>
    %332 = arith.addf %329, %331 : vector<2x128xf32>
    %c0_161 = arith.constant 0 : index
    %c0_162 = arith.constant 0 : index
    %333 = vector.load %arg21[%c0_161, %c0_162] : memref<2x128xf32, #tpu.memory_space<vmem>>, vector<2x128xf32>
    tpu.vector_store %arg21[%c0_161, %c0_162], %332 {strides = array<i32>} : memref<2x128xf32, #tpu.memory_space<vmem>>, vector<2x128xf32>,
    return
  }
}

</mosaic_0001>

<bundles_post_ra>
// kernel: tpu_custom_call.1
= control target key start
LH: loop header
LB: loop body
LE: loop exit
PB: predicated region body
PF: predicated region fallthrough
CT: control target
= control target key end

     0   :  { %s3675_s0 = inlined_call_operand.hbm [shape: f32[16,32], index: 0, kind: input, shape index: {}]   ;;  %s3676_s1 = inlined_call_operand.vmem [shape: f32[2,1,8], index: 1, kind: input, shape index: {}]   ;;  %s3677_s2 = inlined_call_operand.vmem [shape: f32[2,32,768], index: 2, kind: input, shape index: {}]   ;;  %s3678_s3 = inlined_call_operand.vmem [shape: f32[2,256,32], index: 3, kind: input, shape index: {}]   ;;  %s3679_s4 = inlined_call_operand.hbm [shape: f32[2,1,32], index: 4, kind: input, shape index: {}]   ;;  %s3680_s5 = inlined_call_operand.hbm [shape: f32[2,1,32], index: 5, kind: input, shape index: {}]   ;;  %s3681_s6 = inlined_call_operand.hbm [shape: f32[2,1,32], index: 6, kind: input, shape index: {}]   ;;  %s3682_s7 = inlined_call_operand.vmem [shape: f32[2,32,64], index: 7, kind: input, shape index: {}]   ;;  %s3683_s8 = inlined_call_operand.hbm [shape: f32[2,1,64], index: 8, kind: input, shape index: {}]   ;;  %s3684_s9 = inlined_call_operand.vmem [shape: f32[2,64,32], index: 9, kind: input, shape index: {}]   ;;  %s3685_s10 = inlined_call_operand.hbm [shape: f32[2,1,32], index: 10, kind: input, shape index: {}]   ;;  %s3686_s11 = inlined_call_operand.hbm [shape: f32[2,1,32], index: 11, kind: input, shape index: {}]   ;;  %s3687_s12 = inlined_call_operand.hbm [shape: f32[2,1,32], index: 12, kind: input, shape index: {}]   ;;  %s3688_s13 = inlined_call_operand.hbm [shape: f32[32,768], index: 13, kind: input, shape index: {}]   ;;  %s3689_s14 = inlined_call_operand.vmem [shape: f32[1,768], index: 14, kind: input, shape index: {}]   ;;  %s3690_s15 = inlined_call_operand.vmem [shape: f32[256,128], index: 15, kind: input, shape index: {}]   ;;  %s3691_s16 = inlined_call_operand.hbm [shape: f32[1,128], index: 16, kind: input, shape index: {}]   ;;  %s3692_s17 = inlined_call_operand.hbm [shape: f32[128,128], index: 17, kind: input, shape index: {}]   ;;  %s3693_s18 = inlined_call_operand.vmem [shape: f32[1,128], index: 18, kind: input, shape index: {}]   ;;  %s3694_s19 = inlined_call_operand.hbm [shape: f32[128,128], index: 19, kind: input, shape index: {}]   ;;  %s3695_s20 = inlined_call_operand.vmem [shape: f32[1,128], index: 20, kind: input, shape index: {}]   ;;  %s3696_s21 = inlined_call_operand.hbm [shape: f32[2,128], index: 21, kind: output, shape index: {}]  }
   0x1   :  { %3700 = sst [smem:[#allocation31_spill]] %s3675_s0 }
   0x2   :  { %3701 = sst [smem:[#allocation32_spill]] %s3676_s1 }
   0x3   :  { %3702 = sst [smem:[#allocation33_spill]] %s3677_s2 }
   0x4   :  { %3703 = sst [smem:[#allocation34_spill]] %s3678_s3 }
   0x5   :  { %3704 = sst [smem:[#allocation35_spill]] %s3679_s4 }
   0x6   :  { %3705 = sst [smem:[#allocation36_spill]] %s3680_s5 }
   0x7   :  { %26 = vsyncpa [#allocation3], 0 }
   0x8   :  { %27 = vsyncpa [#allocation6], 0 }
   0x9   :  { %28 = vsyncpa [#allocation9], 0 }
   0xa   :  { %29 = vsyncpa [#allocation12], 0 }
   0xb   :  { %30 = vsyncpa [#allocation15], 0 }
   0xc   :  { %31 = vsyncpa [#allocation18], 0 }
   0xd   :  { %32 = vsyncpa [#allocation21], 0  ;;  %s3706_s26 = sld [smem:[#allocation35_spill]] }
  0x13   :  { %s57_s27 = sshll.u32 %s3706_s26, 4  ;;  %s58_s27 = int_to_ptr.hbm [resolvable:$true] %s57_s27 }
  0x14   :  { %33 = vsyncpa [#allocation4], 0  ;;  %s2696_s3 = smov [#allocation5]   ;;  %s83_s4 = sshll.u32 %s3681_s6, 4  ;;  %s84_s4 = int_to_ptr.hbm [resolvable:$true] %s83_s4 }
  0x15   :  { %s59_s28 = sshll.u32 %s2696_s3, 4  ;;  %s2697_s30 = smov 16   ;;  %s60_s28 = int_to_ptr.vmem [resolvable:$true] %s59_s28 }
  0x16   :  { %s2698_s5 = smov 1   ;;  %s2699_s22 = smov [#allocation8]  }
  0x17   :  { %65 = dma.hbm_to_vmem [thread:$0]  %s58_s27, 32, %s60_s28, [#allocation6], %s2697_s30, %s2697_s30, %s2698_s5  }
  0x18   :  { %s85_s23 = sshll.u32 %s2699_s22, 4  ;;  %s113_s2 = sshll.u32 %s3685_s10, 4  ;;  %s86_s23 = int_to_ptr.vmem [resolvable:$true] %s85_s23  ;;  %s114_s2 = int_to_ptr.hbm [resolvable:$true] %s113_s2 }
  0x19   :  { %91 = dma.hbm_to_vmem [thread:$0]  %s84_s4, 32, %s86_s23, [#allocation9], %s2697_s30, %s2697_s30, %s2698_s5  }
  0x1a   :  { %s139_s26 = sshll.u32 %s3687_s12, 4  ;;  %s2700_s3 = smov [#allocation11]   ;;  %s140_s26 = int_to_ptr.hbm [resolvable:$true] %s139_s26 }
  0x1b   :  { %s115_s29 = sshll.u32 %s2700_s3, 4  ;;  %s2701_s27 = smov [#allocation14]   ;;  %s116_s29 = int_to_ptr.vmem [resolvable:$true] %s115_s29 }
  0x1c   :  { %121 = dma.hbm_to_vmem [thread:$0]  %s114_s2, 32, %s116_s29, [#allocation12], %s2697_s30, %s2697_s30, %s2698_s5  }
  0x1d   :  { %s141_s10 = sshll.u32 %s2701_s27, 4  ;;  %s170_s22 = sshll.u32 %s3691_s16, 4  ;;  %s142_s10 = int_to_ptr.vmem [resolvable:$true] %s141_s10  ;;  %s171_s22 = int_to_ptr.hbm [resolvable:$true] %s170_s22 }
  0x1e   :  { %147 = dma.hbm_to_vmem [thread:$0]  %s140_s26, 32, %s142_s10, [#allocation15], %s2697_s30, %s2697_s30, %s2698_s5  }
  0x1f   :  { %s3707_s23 = sld [smem:[#allocation31_spill]]  ;;  %s2702_s24 = smov [#allocation17]  }
  0x20   :  { %s172_s6 = sshll.u32 %s2702_s24, 4  ;;  %s2703_s2 = smov [#allocation2]   ;;  %s173_s6 = int_to_ptr.vmem [resolvable:$true] %s172_s6 }
  0x21   :  { %175 = dma.hbm_to_vmem [thread:$0]  %s171_s22, 16, %s173_s6, [#allocation18]  }
  0x22   :  { %s40_s25 = sshll.u32 %s2703_s2, 4  ;;  %s2704_s3 = smov 128   ;;  %s41_s25 = int_to_ptr.vmem [resolvable:$true] %s40_s25 }
  0x23   :  { %s2705_s16 = smov 8   ;;  %s3708_s27 = sld [smem:[#allocation36_spill]] }
  0x24   :  { %s2706_s28 = smov [#allocation7]   ;;  %s98_s22 = sshll.u32 %s3683_s8, 4  ;;  %s99_s22 = int_to_ptr.hbm [resolvable:$true] %s98_s22 }
  0x25   :  { %s38_s1 = sshll.u32 %s3707_s23, 4  ;;  %s72_s0 = sshll.u32 %s2706_s28, 4  ;;  %s39_s1 = int_to_ptr.hbm [resolvable:$true] %s38_s1  ;;  %s73_s0 = int_to_ptr.vmem [resolvable:$true] %s72_s0 }
  0x26   :  { %46 = dma.hbm_to_vmem [thread:$0]  %s39_s1, 256, %s41_s25, [#allocation3], %s2704_s3, %s2704_s3, %s2705_s16  }
  0x27   :  { %s2707_s23 = smov [#allocation10]   ;;  %s126_s2 = sshll.u32 %s3686_s11, 4  ;;  %s127_s2 = int_to_ptr.hbm [resolvable:$true] %s126_s2 }
  0x28   :  { %s100_s24 = sshll.u32 %s2707_s23, 4  ;;  %s152_s8 = sshll.u32 %s3688_s13, 4  ;;  %s101_s24 = int_to_ptr.vmem [resolvable:$true] %s100_s24  ;;  %s153_s8 = int_to_ptr.hbm [resolvable:$true] %s152_s8 }
  0x29   :  { %s70_s10 = sshll.u32 %s3708_s27, 4  ;;  %s2708_s26 = smov [#allocation13]   ;;  %s71_s10 = int_to_ptr.hbm [resolvable:$true] %s70_s10 }
  0x2a   :  { %78 = dma.hbm_to_vmem [thread:$0]  %s71_s10, 32, %s73_s0, [#allocation6], %s2697_s30, %s2697_s30, %s2698_s5  }
  0x2b   :  { %106 = dma.hbm_to_vmem [thread:$0]  %s99_s22, 32, %s101_s24, [#allocation9], %s2697_s30, %s2697_s30, %s2698_s5  }
  0x2c   :  { %s128_s27 = sshll.u32 %s2708_s26, 4  ;;  %s2709_s10 = smov [#allocation16]   ;;  %s129_s27 = int_to_ptr.vmem [resolvable:$true] %s128_s27 }
  0x2d   :  { %134 = dma.hbm_to_vmem [thread:$0]  %s127_s2, 32, %s129_s27, [#allocation12], %s2697_s30, %s2697_s30, %s2698_s5  }
  0x2e   :  { %s154_s11 = sshll.u32 %s2709_s10, 4  ;;  %s2710_s28 = smov 768   ;;  %s155_s11 = int_to_ptr.vmem [resolvable:$true] %s154_s11 }
  0x2f   :  { %s2711_s0 = smov 48   ;;  %s180_s22 = sshll.u32 %s3692_s17, 4  ;;  %s181_s22 = int_to_ptr.hbm [resolvable:$true] %s180_s22 }
  0x30   :  { %160 = dma.hbm_to_vmem [thread:$0]  %s153_s8, 3072, %s155_s11, [#allocation15], %s2710_s28, %s2710_s28, %s2711_s0  }
  0x31   :  { %s2712_s13 = smov [#allocation19]   ;;  %s195_s6 = sshll.u32 %s3694_s19, 4  ;;  %s196_s6 = int_to_ptr.hbm [resolvable:$true] %s195_s6 }
  0x32   :  { %s182_s23 = sshll.u32 %s2712_s13, 4  ;;  %s2713_s30 = smov [#allocation20]   ;;  %s183_s23 = int_to_ptr.vmem [resolvable:$true] %s182_s23 }
  0x33   :  { %188 = dma.hbm_to_vmem [thread:$0]  %s181_s22, 2048, %s183_s23, [#allocation18], %s2704_s3, %s2704_s3, %s2705_s16  }
  0x34   :  { %s197_s5 = sshll.u32 %s2713_s30, 4  ;;  %s198_s5 = int_to_ptr.vmem [resolvable:$true] %s197_s5 }
  0x35   :  { %203 = dma.hbm_to_vmem [thread:$0]  %s196_s6, 2048, %s198_s5, [#allocation21], %s2704_s3, %s2704_s3, %s2705_s16  }
  0x36   :  { %2680 = dma.done.wait [#allocation3], 256  }
  0x37   :  { %2681 = vsyncadd [#allocation3], 4294967040 }
  0x38   :  { %2682 = dma.done.wait [#allocation6], 64  }
  0x39   :  { %2683 = vsyncadd [#allocation6], 4294967232 }
  0x3a   :  { %2684 = dma.done.wait [#allocation9], 64  }
  0x3b   :  { %2685 = vsyncadd [#allocation9], 4294967232 }
  0x3c   :  { %2686 = dma.done.wait [#allocation12], 64  }
  0x3d   :  { %2687 = vsyncadd [#allocation12], 4294967232 }
  0x3e   :  { %2688 = dma.done.wait [#allocation15], 3104  }
  0x3f   :  { %2689 = vsyncadd [#allocation15], 4294964192 }
  0x40   :  { %2690 = dma.done.wait [#allocation18], 2064  }
  0x41   :  { %2691 = vsyncadd [#allocation18], 4294965232 }
  0x42   :  { %2692 = dma.done.wait [#allocation21], 2048  }
  0x43   :  { %2693 = vsyncadd [#allocation21], 4294965248  ;;  %s3709_s2 = sld [smem:[#allocation33_spill]]  ;;  %v2928_v12 = vld [vmem:[#allocation2] sm:$0xff]  ;;  %vm282_vm0 = vcmask 261120   ;;  %v2958_v21 = vld [vmem:[#allocation2 + $0x8] sm:$0xff] }
  0x44   :  { %s3710_s16 = sld [smem:[#allocation32_spill]]  ;;  %vm477_vm1 = vcmask 64512   ;;  %vm870_vm7 = vcmask 523264   ;;  %s2715_s23 = smov [#allocation22]  }
  0x45   :  { %s3711_s10 = sld [smem:[#allocation34_spill]]  ;;  %s2107_s24 = sshll.u32 %s2715_s23, 4  ;;  %s2108_s24 = int_to_ptr.vmem [resolvable:$true] %s2107_s24 }
  0x46   :  { %s2109_s30 = sshll.u32 %s3696_s21, 4  ;;  %s2110_s30 = int_to_ptr.hbm [resolvable:$true] %s2109_s30 }
  0x49   :  { %v278_v0 = vld [vmem:[%s3709_s2 + $0xa0] sm:$0xff]  ;;  %v279_v1 = vld [vmem:[%s3709_s2 + $0xa8] sm:$0xff]  ;;  %v272_v2 = vld [vmem:[%s3709_s2 + $0x70] sm:$0xff] }
  0x4a   :  { %347 = vmatpush.msra.mxu2 %v278_v0  ;;  %370 = vmatpush.msra.mxu3 %v279_v1  ;;  %v273_v3 = vld [vmem:[%s3709_s2 + $0x78] sm:$0xff]  ;;  %v266_v4 = vld [vmem:[%s3709_s2 + $0x40] sm:$0xff]  ;;  %v267_v5 = vld [vmem:[%s3709_s2 + $0x48] sm:$0xff] }
  0x4b   :  { %v276_v6 = vld [vmem:[%s3709_s2 + $0x90] sm:$0xff]  ;;  %v277_v7 = vld [vmem:[%s3709_s2 + $0x98] sm:$0xff]  ;;  %v270_v8 = vld [vmem:[%s3709_s2 + $0x60] sm:$0xff] }
  0x4c   :  { %348 = vmatpush.msra.mxu2 %v272_v2  ;;  %371 = vmatpush.msra.mxu3 %v273_v3  ;;  %v260_v9 = vld [vmem:[%s3709_s2 + $0x10] sm:$0xff]  ;;  %v261_v10 = vld [vmem:[%s3709_s2 + $0x18] sm:$0xff]  ;;  %v271_v11 = vld [vmem:[%s3709_s2 + $0x68] sm:$0xff] }
  0x4d   :  { %301 = vmatpush.msra.mxu0 %v276_v6  ;;  %324 = vmatpush.msra.mxu1 %v277_v7  ;;  %v264_v13 = vld [vmem:[%s3709_s2 + $0x30] sm:$0xff]  ;;  %v265_v14 = vld [vmem:[%s3709_s2 + $0x38] sm:$0xff]  ;;  %v258_v15 = vld [vmem:[%s3709_s2] sm:$0xff] }
  0x4e   :  { %349 = vmatpush.msra.mxu2 %v266_v4  ;;  %372 = vmatpush.msra.mxu3 %v267_v5  ;;  %v259_v16 = vld [vmem:[%s3709_s2 + $0x8] sm:$0xff]  ;;  %v280_v17 = vld [vmem:[%s3709_s2 + $0xb0] sm:$0xff]  ;;  %v281_v18 = vld [vmem:[%s3709_s2 + $0xb8] sm:$0xff] }
  0x4f   :  { %302 = vmatpush.msra.mxu0 %v270_v8  ;;  %325 = vmatpush.msra.mxu1 %v271_v11  ;;  %v274_v19 = vld [vmem:[%s3709_s2 + $0x80] sm:$0xff]  ;;  %v275_v20 = vld [vmem:[%s3709_s2 + $0x88] sm:$0xff]  ;;  %v268_v22 = vld [vmem:[%s3709_s2 + $0x50] sm:$0xff] }
  0x50   :  { %350 = vmatpush.msra.mxu2 %v260_v9  ;;  %373 = vmatpush.msra.mxu3 %v261_v10  ;;  %v269_v23 = vld [vmem:[%s3709_s2 + $0x58] sm:$0xff]  ;;  %v262_v24 = vld [vmem:[%s3709_s2 + $0x20] sm:$0xff]  ;;  %v263_v25 = vld [vmem:[%s3709_s2 + $0x28] sm:$0xff] }
  0x51   :  { %2129 = vmatmul.msk.f32.vlgmr.msra.gmra.mxu2 %vm282_vm0, %v2928_v12  ;;  %2131 = vmatmul.msk.f32.vlgmr.msra.gmra.mxu3 %vm282_vm0, %v2928_v12  ;;  %v2995_v38 = vld [vmem:[%s3710_s16] ss:$0 sm:$0xff]  ;;  %v3002_v45 = vld [vmem:[%s3710_s16 + $0x1] ss:$0 sm:$0xff] }
  0x52   :  { %303 = vmatpush.msra.mxu0 %v264_v13  ;;  %326 = vmatpush.msra.mxu1 %v265_v14  ;;  %v673_v13 = vld [vmem:[%s3711_s10 + $0x78] sm:$0xff]  ;;  %v672_v14 = vld [vmem:[%s3711_s10 + $0x70] sm:$0xff] }
  0x54   :  { %304 = vmatpush.msra.mxu0 %v258_v15  ;;  %327 = vmatpush.msra.mxu1 %v259_v16  ;;  %v689_v15 = vld [vmem:[%s3711_s10 + $0xf8] sm:$0xff]  ;;  %v671_v16 = vld [vmem:[%s3711_s10 + $0x68] sm:$0xff] }
  0x55   :  { %2125 = vmatmul.msk.f32.vlgmr.msra.gmra.mxu0 %vm282_vm0, %v2928_v12  ;;  %2127 = vmatmul.msk.f32.vlgmr.msra.gmra.mxu1 %vm282_vm0, %v2928_v12 }
  0x56   :  { %393 = vmatpush.msrb.mxu0 %v280_v17  ;;  %416 = vmatpush.msrb.mxu1 %v281_v18  ;;  %v688_v17 = vld [vmem:[%s3711_s10 + $0xf0] sm:$0xff]  ;;  %v687_v18 = vld [vmem:[%s3711_s10 + $0xe8] sm:$0xff] }
  0x58   :  { %394 = vmatpush.msrb.mxu0 %v274_v19  ;;  %417 = vmatpush.msrb.mxu1 %v275_v20  ;;  %v670_v19 = vld [vmem:[%s3711_s10 + $0x60] sm:$0xff] }
  0x59   :  { %2130 = vmatmul.msk.f32.gmra.mxu2 %vm282_vm0, %v2958_v21  ;;  %2132 = vmatmul.msk.f32.gmra.mxu3 %vm282_vm0, %v2958_v21  ;;  %v686_v20 = vld [vmem:[%s3711_s10 + $0xe0] sm:$0xff] }
  0x5a   :  { %395 = vmatpush.msrb.mxu0 %v268_v22  ;;  %418 = vmatpush.msrb.mxu1 %v269_v23  ;;  %v669_v23 = vld [vmem:[%s3711_s10 + $0x58] sm:$0xff] }
  0x5c   :  { %396 = vmatpush.msrb.mxu0 %v262_v24  ;;  %419 = vmatpush.msrb.mxu1 %v263_v25  ;;  %v685_v24 = vld [vmem:[%s3711_s10 + $0xd8] sm:$0xff]  ;;  %v668_v25 = vld [vmem:[%s3711_s10 + $0x50] sm:$0xff] }
  0x5d   :  { %2126 = vmatmul.msk.f32.gmra.mxu0 %vm282_vm0, %v2958_v21  ;;  %2128 = vmatmul.msk.f32.gmra.mxu1 %vm282_vm0, %v2958_v21 }
  0x65   :  { %2133 = vmatmul.msk.f32.vlgmr.msrb.gmra.mxu0 %vm282_vm0, %v2928_v12  ;;  %2135 = vmatmul.msk.f32.vlgmr.msrb.gmra.mxu1 %vm282_vm0, %v2928_v12 }
  0x6d   :  { %2134 = vmatmul.msk.f32.gmra.mxu0 %vm282_vm0, %v2958_v21  ;;  %2136 = vmatmul.msk.f32.gmra.mxu1 %vm282_vm0, %v2958_v21 }
  0xd2   :  { %v306_v26 = vpop.f32.mrf.mxu0  ;;  %v329_v27 = vpop.f32.mrf.mxu1 }
  0xd4   :  { %v352_v28 = vpop.f32.mrf.mxu2  ;;  %v375_v29 = vpop.f32.mrf.mxu3 }
  0xd5   :  { %442 = vmatpush.xpose.msrb.mxu2 %v352_v28  ;;  %561 = vmatpush.xpose.msra.mxu0 %v375_v29  ;;  %v667_v28 = vld [vmem:[%s3711_s10 + $0x48] sm:$0xff] }
  0xd6   :  { %v683_v29 = vld [vmem:[%s3711_s10 + $0xc8] sm:$0xff] }
  0xd8   :  { %443 = vmatmul.f32.vlgmr.msrb.gmra.mxu2 %v306_v26  ;;  %562 = vmatmul.f32.vlgmr.msra.gmra.mxu0 %v329_v27  ;;  %v684_v26 = vld [vmem:[%s3711_s10 + $0xd0] sm:$0xff] }
  0xd9   :  { %694 = vmatpush.msrb.mxu0 %v673_v13 }
  0xda   :  { %v309_v30 = vpop.f32.mrf.mxu0  ;;  %v332_v31 = vpop.f32.mrf.mxu1 }
  0xdb   :  { %695 = vmatpush.msrb.mxu0 %v672_v14 }
  0xdc   :  { %v355_v32 = vpop.f32.mrf.mxu2  ;;  %v378_v33 = vpop.f32.mrf.mxu3 }
  0xdd   :  { %462 = vmatpush.xpose.msrb.mxu3 %v355_v32  ;;  %581 = vmatpush.xpose.msra.mxu1 %v378_v33  ;;  %v682_v32 = vld [vmem:[%s3711_s10 + $0xc0] sm:$0xff] }
  0xde   :  { %696 = vmatpush.msrb.mxu0 %v671_v16 }
  0xe0   :  { %463 = vmatmul.f32.vlgmr.msrb.gmra.mxu3 %v309_v30  ;;  %582 = vmatmul.f32.vlgmr.msra.gmra.mxu1 %v332_v31  ;;  %v666_v30 = vld [vmem:[%s3711_s10 + $0x40] sm:$0xff] }
  0xe1   :  { %717 = vmatpush.msrb.mxu1 %v689_v15  ;;  %697 = vmatpush.msrb.mxu0 %v670_v19 }
  0xe2   :  { %v398_v34 = vpop.f32.mrf.mxu0  ;;  %v421_v35 = vpop.f32.mrf.mxu1 }
  0xe3   :  { %518 = vmatpush.msra.mxu2 %v398_v34  ;;  %718 = vmatpush.msrb.mxu1 %v688_v17  ;;  %v2714_v17 = vmov 32.0  }
  0xe4   :  { %698 = vmatpush.msrb.mxu0 %v669_v23 }
  0xe5   :  { %630 = vmatpush.msrb.mxu2 %v421_v35  ;;  %719 = vmatpush.msrb.mxu1 %v687_v18  ;;  %v665_v35 = vld [vmem:[%s3711_s10 + $0x38] sm:$0xff] }
  0xe6   :  { %699 = vmatpush.msrb.mxu0 %v668_v25 }
  0xe7   :  { %720 = vmatpush.msrb.mxu1 %v686_v20 }
  0xe8   :  { %700 = vmatpush.msrb.mxu0 %v667_v28  ;;  %v819_v28 = vld [vmem:[%s3682_s7] sm:$0xff] }
  0xe9   :  { %721 = vmatpush.msrb.mxu1 %v685_v24  ;;  %v821_v24 = vld [vmem:[%s3682_s7 + $0x10] sm:$0xff] }
  0xea   :  { %v401_v36 = vpop.f32.mrf.mxu0  ;;  %v424_v37 = vpop.f32.mrf.mxu1  ;;  %701 = vmatpush.msrb.mxu0 %v666_v30 }
  0xeb   :  { %541 = vmatpush.msra.mxu3 %v401_v36  ;;  %722 = vmatpush.msrb.mxu1 %v684_v26  ;;  %v681_v36 = vld [vmem:[%s3711_s10 + $0xb8] sm:$0xff]  ;;  %v820_v26 = vld [vmem:[%s3682_s7 + $0x8] sm:$0xff] }
  0xec   :  { %702 = vmatpush.msrb.mxu0 %v665_v35 }
  0xed   :  { %653 = vmatpush.msrb.mxu3 %v424_v37  ;;  %723 = vmatpush.msrb.mxu1 %v683_v29  ;;  %v664_v37 = vld [vmem:[%s3711_s10 + $0x30] sm:$0xff] }
  0xee   :  { %703 = vmatpush.msrb.mxu0 %v664_v37 }
  0xef   :  { %724 = vmatpush.msrb.mxu1 %v682_v32 }
  0xf1   :  { %725 = vmatpush.msrb.mxu1 %v681_v36 }
 0x155   :  { %v563_v39 = vpop.f32.mrf.mxu0 }
 0x156   :  { %v586_v40 = vmul.f32 0.17677669, %v563_v39  ;;  %v680_v39 = vld [vmem:[%s3711_s10 + $0xb0] sm:$0xff] }
 0x157   :  { %726 = vmatpush.msrb.mxu1 %v680_v39 }
 0x158   :  { %v588_v41 = vadd.f32 %v2995_v38, %v586_v40 }
 0x15a   :  { %v590_v42 = vsel %vm477_vm1, %v588_v41, -inf }
 0x15b   :  { %v444_v43 = vpop.f32.mrf.mxu2  ;;  %591 = vmax.xlane.f32.xlu1 %v590_v42 }
 0x15c   :  { %v467_v44 = vmul.f32 0.17677669, %v444_v43  ;;  %v679_v43 = vld [vmem:[%s3711_s10 + $0xa8] sm:$0xff] }
 0x15d   :  { %v583_v46 = vpop.f32.mrf.mxu1  ;;  %727 = vmatpush.msrb.mxu1 %v679_v43 }
 0x15e   :  { %v587_v47 = vmul.f32 0.17677669, %v583_v46  ;;  %v475_v48 = vadd.f32 %v2995_v38, %v467_v44  ;;  %v662_v44 = vld [vmem:[%s3711_s10 + $0x20] sm:$0xff] }
 0x160   :  { %v478_v49 = vsel %vm477_vm1, %v475_v48, -inf  ;;  %v589_v50 = vadd.f32 %v3002_v45, %v587_v47 }
 0x161   :  { %479 = vmax.xlane.f32.xlu0 %v478_v49  ;;  %v661_v49 = vld [vmem:[%s3711_s10 + $0x18] sm:$0xff] }
 0x162   :  { %v593_v51 = vsel %vm477_vm1, %v589_v50, -inf }
 0x163   :  { %v464_v52 = vpop.f32.mrf.mxu3  ;;  %594 = vmax.xlane.f32.xlu1 %v593_v51  ;;  %v659_v51 = vld [vmem:[%s3711_s10 + $0x8] sm:$0xff] }
 0x164   :  { %v468_v53 = vmul.f32 0.17677669, %v464_v52 }
 0x166   :  { %v476_v54 = vadd.f32 %v3002_v45, %v468_v53 }
 0x168   :  { %v481_v55 = vsel %vm477_vm1, %v476_v54, -inf }
 0x169   :  { %482 = vmax.xlane.f32.xlu0 %v481_v55  ;;  %v678_v55 = vld [vmem:[%s3711_s10 + $0xa0] sm:$0xff] }
 0x16a   :  { %728 = vmatpush.msrb.mxu1 %v678_v55  ;;  %v863_v55 = vld [vmem:[%s3684_s9 + $0x28] sm:$0xff] }
 0x1ce   :  { %v592_v56 = vpop.xlane.xlu1 %591 }
 0x1cf   :  { %v596_v57 = vsub.f32 %v588_v41, %v592_v56  ;;  %v663_v41 = vld [vmem:[%s3711_s10 + $0x28] sm:$0xff]  ;;  %v677_v56 = vld [vmem:[%s3711_s10 + $0x98] sm:$0xff] }
 0x1d0   :  { %704 = vmatpush.msrb.mxu0 %v663_v41  ;;  %729 = vmatpush.msrb.mxu1 %v677_v56 }
 0x1d1   :  { %v598_v58 = vmul.f32 1.442695, %v596_v57  ;;  %v676_v57 = vld [vmem:[%s3711_s10 + $0x90] sm:$0xff] }
 0x1d2   :  { %705 = vmatpush.msrb.mxu0 %v662_v44  ;;  %730 = vmatpush.msrb.mxu1 %v676_v57 }
 0x1d3   :  { %2278 = vpow2.f32 %v598_v58  ;;  %v675_v58 = vld [vmem:[%s3711_s10 + $0x88] sm:$0xff] }
 0x1d4   :  { %v480_v59 = vpop.xlane.xlu0 %479  ;;  %706 = vmatpush.msrb.mxu0 %v661_v49  ;;  %731 = vmatpush.msrb.mxu1 %v675_v58  ;;  %v862_v58 = vld [vmem:[%s3684_s9 + $0x20] sm:$0xff] }
 0x1d5   :  { %v484_v60 = vsub.f32 %v475_v48, %v480_v59  ;;  %v674_v59 = vld [vmem:[%s3711_s10 + $0x80] sm:$0xff] }
 0x1d6   :  { %v595_v61 = vpop.xlane.xlu1 %594  ;;  %732 = vmatpush.msrb.mxu1 %v674_v59 }
 0x1d7   :  { %v486_v62 = vmul.f32 1.442695, %v484_v60  ;;  %v597_v63 = vsub.f32 %v589_v50, %v595_v61  ;;  %v660_v50 = vld [vmem:[%s3711_s10 + $0x10] sm:$0xff] }
 0x1d8   :  { %707 = vmatpush.msrb.mxu0 %v660_v50 }
 0x1d9   :  { %v3010_v0 = vpop.eup %2278  ;;  %2280 = vpow2.f32 %v486_v62  ;;  %v600_v1 = vmul.f32 1.442695, %v597_v63 }
 0x1da   :  { %v602_v2 = vsel %vm477_vm1, %v3010_v0, 0.0  ;;  %708 = vmatpush.msrb.mxu0 %v659_v51  ;;  %v865_v51 = vld [vmem:[%s3684_s9 + $0x38] sm:$0xff] }
 0x1db   :  { %2282 = vpow2.f32 %v600_v1  ;;  %603 = vadd.xlane.f32.xlu0 %v602_v2  ;;  %v2261_v1 = vld [vmem:[#allocation5] ss:$0 sm:$0xff] }
 0x1dc   :  { %v483_v3 = vpop.xlane.xlu0 %482 }
 0x1dd   :  { %v485_v4 = vsub.f32 %v476_v54, %v483_v3  ;;  %v658_v54 = vld [vmem:[%s3711_s10] sm:$0xff] }
 0x1de   :  { %709 = vmatpush.msrb.mxu0 %v658_v54 }
 0x1df   :  { %v2281_v5 = vpop.eup %2280  ;;  %v488_v6 = vmul.f32 1.442695, %v485_v4 }
 0x1e0   :  { %v490_v7 = vsel %vm477_vm1, %v2281_v5, 0.0 }
 0x1e1   :  { %v3015_v8 = vpop.eup %2282  ;;  %2284 = vpow2.f32 %v488_v6  ;;  %491 = vadd.xlane.f32.xlu2 %v490_v7 }
 0x1e2   :  { %v605_v9 = vsel %vm477_vm1, %v3015_v8, 0.0 }
 0x1e3   :  { %606 = vadd.xlane.f32.xlu1 %v605_v9 }
 0x1e7   :  { %v2285_v10 = vpop.eup %2284 }
 0x1e8   :  { %v493_v11 = vsel %vm477_vm1, %v2285_v10, 0.0 }
 0x1e9   :  { %494 = vadd.xlane.f32.xlu2 %v493_v11 }
 0x24e   :  { %v604_v27 = vpop.xlane.xlu0 %603 }
 0x254   :  { %v492_v22 = vpop.xlane.xlu2 %491 }
 0x255   :  { %2286 = vrcp.f32 %v492_v22 }
 0x256   :  { %2288 = vrcp.f32 %v604_v27  ;;  %v607_v40 = vpop.xlane.xlu1 %606 }
 0x25b   :  { %v2287_v31 = vpop.eup %2286 }
 0x25c   :  { %v498_v33 = vmul.f32 %v2287_v31, %v2281_v5  ;;  %v495_v34 = vpop.xlane.xlu2 %494  ;;  %v2289_v42 = vpop.eup %2288 }
 0x25d   :  { %2290 = vrcp.f32 %v495_v34  ;;  %v610_v47 = vmul.f32 %v2289_v42, %v3010_v0 }
 0x25e   :  { %2137 = vmatmul.msk.f32.vlgmr.msra.gmra.mxu2 %vm477_vm1, %v498_v33  ;;  %2292 = vrcp.f32 %v607_v40 }
 0x25f   :  { %2294 = vrcp.f32 %v2714_v17 }
 0x263   :  { %v2291_v46 = vpop.eup %2290 }
 0x264   :  { %v499_v48 = vmul.f32 %v2291_v46, %v2285_v10  ;;  %v2293_v52 = vpop.eup %2292 }
 0x265   :  { %v611_v53 = vmul.f32 %v2293_v52, %v3015_v8  ;;  %v2295_v18 = vpop.eup %2294  ;;  %v864_v52 = vld [vmem:[%s3684_s9 + $0x30] sm:$0xff] }
 0x266   :  { %2138 = vmatmul.msk.f32.vlgmr.msra.gmra.mxu3 %vm477_vm1, %v499_v48  ;;  %2139 = vmatmul.msk.f32.vlgmr.msrb.gmra.mxu2 %vm477_vm1, %v610_v47  ;;  %v751_v19 = vmul.f32 32.0, %v2295_v18  ;;  %vm755_vm2 = vweird.f32 %v2295_v18 }
 0x267   :  { %885 = vmatpush.msra.mxu3 %v865_v51 }
 0x268   :  { %v752_v20 = vsub.f32 1.0, %v751_v19 }
 0x269   :  { %886 = vmatpush.msra.mxu3 %v864_v52 }
 0x26a   :  { %v753_v22 = vmul.f32 %v2295_v18, %v752_v20 }
 0x26b   :  { %887 = vmatpush.msra.mxu3 %v863_v55 }
 0x26c   :  { %v754_v23 = vadd.f32 %v2295_v18, %v753_v22 }
 0x26d   :  { %888 = vmatpush.msra.mxu3 %v862_v58  ;;  %v2166_v58 = vld [vmem:[%s3709_s2 + $0x168] sm:$0xff] }
 0x26e   :  { %2140 = vmatmul.msk.f32.vlgmr.msrb.gmra.mxu3 %vm477_vm1, %v611_v53  ;;  %v3144_v25 = vsel %vm755_vm2, %v2295_v18, %v754_v23  ;;  %1084 = vmatpush.msra.mxu0 %v2166_v58 }
 0x2e1   :  { %v520_v60 = vpop.f32.mrf.mxu2 }
 0x2e2   :  { %710 = vmatmul.f32.vlgmr.msrb.gmra.mxu0 %v520_v60 }
 0x2e9   :  { %v543_v61 = vpop.f32.mrf.mxu3  ;;  %v632_v62 = vpop.f32.mrf.mxu2 }
 0x2ea   :  { %713 = vmatmul.f32.gmra.mxu0 %v543_v61  ;;  %733 = vmatmul.f32.vlgmr.msrb.gmra.mxu1 %v632_v62  ;;  %v861_v62 = vld [vmem:[%s3684_s9 + $0x18] sm:$0xff] }
 0x2eb   :  { %889 = vmatpush.msra.mxu3 %v861_v62  ;;  %v2157_v62 = vld [vmem:[%s3709_s2 + $0x120] sm:$0xff] }
 0x2f1   :  { %v655_v63 = vpop.f32.mrf.mxu3 }
 0x2f2   :  { %736 = vmatmul.f32.gmra.mxu1 %v655_v63 }
 0x35f   :  { %v711_v0 = vpop.f32.mrf.mxu0 }
 0x360   :  { %v712_v2 = vadd.f32 %v2261_v1, %v711_v0 }
 0x367   :  { %v734_v3 = vpop.f32.mrf.mxu1  ;;  %v714_v6 = vpop.f32.mrf.mxu0 }
 0x368   :  { %v735_v4 = vadd.f32 %v734_v3, %v712_v2  ;;  %v715_v9 = vadd.f32 %v2261_v1, %v714_v6 }
 0x36a   :  { %v3123_v5 = vadd.f32 %v735_v4, %v2928_v12 }
 0x36c   :  { %v744_v7 = vsel %vm282_vm0, %v3123_v5, 0.0  ;;  %v759_v8 = vmul.f32 %v3123_v5, %v3123_v5 }
 0x36d   :  { %745 = vadd.xlane.f32.xlu2 %v744_v7 }
 0x36e   :  { %v761_v10 = vsel %vm282_vm0, %v759_v8, 0.0  ;;  %v2262_v8 = vld [vmem:[#allocation7] ss:$0 sm:$0xff] }
 0x36f   :  { %762 = vadd.xlane.f32.xlu0 %v761_v10  ;;  %v737_v11 = vpop.f32.mrf.mxu1 }
 0x370   :  { %v738_v13 = vadd.f32 %v737_v11, %v715_v9 }
 0x372   :  { %v3131_v14 = vadd.f32 %v738_v13, %v2958_v21  ;;  %v822_v21 = vld [vmem:[%s3682_s7 + $0x18] sm:$0xff] }
 0x373   :  { %845 = vmatpush.msra.mxu2 %v822_v21  ;;  %v859_v21 = vld [vmem:[%s3684_s9 + $0x8] sm:$0xff] }
 0x374   :  { %v747_v12 = vsel %vm282_vm0, %v3131_v14, 0.0  ;;  %v760_v15 = vmul.f32 %v3131_v14, %v3131_v14 }
 0x375   :  { %748 = vadd.xlane.f32.xlu1 %v747_v12  ;;  %846 = vmatpush.msra.mxu2 %v821_v24  ;;  %v2263_v12 = vld [vmem:[#allocation8] ss:$0 sm:$0xff]  ;;  %v858_v24 = vld [vmem:[%s3684_s9] sm:$0xff] }
 0x376   :  { %v764_v16 = vsel %vm282_vm0, %v760_v15, 0.0 }
 0x377   :  { %765 = vadd.xlane.f32.xlu2 %v764_v16  ;;  %847 = vmatpush.msra.mxu2 %v820_v26 }
 0x379   :  { %848 = vmatpush.msra.mxu2 %v819_v28 }
 0x3e0   :  { %v746_v27 = vpop.xlane.xlu2 %745 }
 0x3e1   :  { %v757_v29 = vmul.f32 %v3144_v25, %v746_v27 }
 0x3e2   :  { %v763_v30 = vpop.xlane.xlu0 %762 }
 0x3e3   :  { %v769_v31 = vmul.f32 %v757_v29, %v757_v29  ;;  %v767_v32 = vmul.f32 %v763_v30, %v3144_v25  ;;  %v801_v7 = vsub.f32 %v3123_v5, %v757_v29  ;;  %v860_v5 = vld [vmem:[%s3684_s9 + $0x10] sm:$0xff] }
 0x3e4   :  { %890 = vmatpush.msra.mxu3 %v860_v5  ;;  %v2168_v5 = vld [vmem:[%s3709_s2 + $0x178] sm:$0xff] }
 0x3e5   :  { %v771_v33 = vsub.f32 %v767_v32, %v769_v31  ;;  %v2265_v32 = vld [vmem:[#allocation11] ss:$0 sm:$0xff] }
 0x3e6   :  { %891 = vmatpush.msra.mxu3 %v859_v21  ;;  %v2159_v21 = vld [vmem:[%s3709_s2 + $0x130] sm:$0xff] }
 0x3e7   :  { %v773_v34 = vmax.f32 %v771_v33, 0.0 }
 0x3e8   :  { %v749_v35 = vpop.xlane.xlu1 %748  ;;  %892 = vmatpush.msra.mxu3 %v858_v24 }
 0x3e9   :  { %v775_v36 = vmul.f32 1.032258, %v773_v34  ;;  %v758_v37 = vmul.f32 %v3144_v25, %v749_v35 }
 0x3ea   :  { %v766_v39 = vpop.xlane.xlu2 %765 }
 0x3eb   :  { %2296 = vrsqrt.f32 %v775_v36  ;;  %v770_v40 = vmul.f32 %v758_v37, %v758_v37  ;;  %v768_v41 = vmul.f32 %v766_v39, %v3144_v25  ;;  %vm784_vm3 = vcmp.eq.f32.partialorder %v775_v36, inf }
 0x3ec   :  { %v787_v59 = vand.u32 2147483648, %v775_v36  ;;  %vm786_vm4 = vcmp.eq.f32.partialorder %v775_v36, 0.0  ;;  %v802_v18 = vsub.f32 %v3131_v14, %v758_v37  ;;  %v2264_v14 = vld [vmem:[#allocation10] ss:$0 sm:$0xff] }
 0x3ed   :  { %v772_v42 = vsub.f32 %v768_v41, %v770_v40 }
 0x3ef   :  { %v774_v43 = vmax.f32 %v772_v42, 0.0 }
 0x3f1   :  { %v2297_v44 = vpop.eup %2296  ;;  %v776_v47 = vmul.f32 1.032258, %v774_v43 }
 0x3f2   :  { %v778_v46 = vmul.f32 %v2297_v44, %v775_v36 }
 0x3f3   :  { %2298 = vrsqrt.f32 %v776_v47  ;;  %vm796_vm5 = vcmp.eq.f32.partialorder %v776_v47, inf  ;;  %v799_v6 = vand.u32 2147483648, %v776_v47  ;;  %vm798_vm6 = vcmp.eq.f32.partialorder %v776_v47, 0.0 }
 0x3f4   :  { %v779_v48 = vmul.f32 %v2297_v44, %v778_v46 }
 0x3f6   :  { %v780_v49 = vmul.f32 0.5, %v779_v48 }
 0x3f8   :  { %v781_v50 = vsub.f32 1.5, %v780_v49 }
 0x3f9   :  { %v2299_v53 = vpop.eup %2298 }
 0x3fa   :  { %v782_v54 = vmul.f32 %v2297_v44, %v781_v50  ;;  %v790_v56 = vmul.f32 %v2299_v53, %v776_v47 }
 0x3fc   :  { %v783_v57 = vmul.f32 %v782_v54, %v775_v36  ;;  %v791_v60 = vmul.f32 %v2299_v53, %v790_v56  ;;  %v2163_v56 = vld [vmem:[%s3709_s2 + $0x150] sm:$0xff] }
 0x3fd   :  { %1015 = vmatpush.msrb.mxu2 %v2163_v56 }
 0x3fe   :  { %v785_v61 = vsel %vm784_vm3, %v775_v36, %v783_v57  ;;  %v792_v0 = vmul.f32 0.5, %v791_v60  ;;  %v2164_v57 = vld [vmem:[%s3709_s2 + $0x158] sm:$0xff]  ;;  %v2167_v60 = vld [vmem:[%s3709_s2 + $0x170] sm:$0xff] }
 0x3ff   :  { %v788_v63 = vsel %vm786_vm4, %v787_v59, %v785_v61  ;;  %1038 = vmatpush.msrb.mxu3 %v2164_v57  ;;  %1107 = vmatpush.msra.mxu1 %v2167_v60 }
 0x400   :  { %v803_v1 = vadd.f32 0.001, %v788_v63  ;;  %v793_v2 = vsub.f32 1.5, %v792_v0  ;;  %v2158_v63 = vld [vmem:[%s3709_s2 + $0x128] sm:$0xff]  ;;  %v2160_v0 = vld [vmem:[%s3709_s2 + $0x138] sm:$0xff]  ;;  %1016 = vmatpush.msrb.mxu2 %v2157_v62 }
 0x401   :  { %1039 = vmatpush.msrb.mxu3 %v2158_v63  ;;  %1085 = vmatpush.msra.mxu0 %v2160_v0 }
 0x402   :  { %2300 = vrcp.f32 %v803_v1  ;;  %v794_v3 = vmul.f32 %v2299_v53, %v793_v2 }
 0x404   :  { %v795_v4 = vmul.f32 %v794_v3, %v776_v47  ;;  %v2161_v3 = vld [vmem:[%s3709_s2 + $0x140] sm:$0xff] }
 0x405   :  { %1108 = vmatpush.msra.mxu1 %v2161_v3 }
 0x406   :  { %v797_v9 = vsel %vm796_vm5, %v776_v47, %v795_v4  ;;  %v2151_v4 = vld [vmem:[%s3709_s2 + $0xf0] sm:$0xff]  ;;  %vm1735_vm5 = vcmask 1041409  }
 0x407   :  { %v800_v11 = vsel %vm798_vm6, %v799_v6, %v797_v9  ;;  %v2152_v6 = vld [vmem:[%s3709_s2 + $0xf8] sm:$0xff]  ;;  %v2145_v9 = vld [vmem:[%s3709_s2 + $0xc0] sm:$0xff]  ;;  %1017 = vmatpush.msrb.mxu2 %v2151_v4 }
 0x408   :  { %v2301_v10 = vpop.eup %2300  ;;  %v804_v15 = vadd.f32 0.001, %v800_v11  ;;  %1040 = vmatpush.msrb.mxu3 %v2152_v6  ;;  %v2146_v11 = vld [vmem:[%s3709_s2 + $0xc8] sm:$0xff] }
 0x409   :  { %v807_v13 = vmul.f32 %v2301_v10, %v801_v7  ;;  %v2154_v7 = vld [vmem:[%s3709_s2 + $0x108] sm:$0xff]  ;;  %1018 = vmatpush.msrb.mxu2 %v2145_v9 }
 0x40a   :  { %2302 = vrcp.f32 %v804_v15  ;;  %1086 = vmatpush.msra.mxu0 %v2154_v7  ;;  %1041 = vmatpush.msrb.mxu3 %v2146_v11 }
 0x40b   :  { %v812_v16 = vmul.f32 %v2262_v8, %v807_v13  ;;  %v2148_v13 = vld [vmem:[%s3709_s2 + $0xd8] sm:$0xff] }
 0x40c   :  { %1087 = vmatpush.msra.mxu0 %v2148_v13 }
 0x40d   :  { %v817_v17 = vadd.f32 %v2263_v12, %v812_v16 }
 0x40f   :  { %2141 = vmatmul.msk.f32.vlgmr.msra.gmra.mxu2 %vm282_vm0, %v817_v17 }
 0x410   :  { %v2303_v19 = vpop.eup %2302 }
 0x411   :  { %v808_v20 = vmul.f32 %v2303_v19, %v802_v18 }
 0x413   :  { %v813_v22 = vmul.f32 %v2262_v8, %v808_v20  ;;  %v2155_v8 = vld [vmem:[%s3709_s2 + $0x110] sm:$0xff] }
 0x414   :  { %1109 = vmatpush.msra.mxu1 %v2155_v8 }
 0x415   :  { %v818_v23 = vadd.f32 %v2263_v12, %v813_v22  ;;  %v2149_v12 = vld [vmem:[%s3709_s2 + $0xe0] sm:$0xff] }
 0x416   :  { %1110 = vmatpush.msra.mxu1 %v2149_v12 }
 0x417   :  { %2142 = vmatmul.msk.f32.gmra.mxu2 %vm282_vm0, %v818_v23 }
 0x492   :  { %v850_v26 = vpop.f32.mrf.mxu2 }
 0x493   :  { %v851_v27 = vadd.f32 %v2264_v14, %v850_v26  ;;  %v2162_v26 = vld [vmem:[%s3709_s2 + $0x148] sm:$0xff] }
 0x495   :  { %v856_v28 = vmax.f32 %v851_v27, 0.0 }
 0x497   :  { %2143 = vmatmul.msk.f32.vlgmr.msra.gmra.mxu3 %vm870_vm7, %v856_v28  ;;  %v2153_v28 = vld [vmem:[%s3709_s2 + $0x100] sm:$0xff] }
 0x498   :  { %1130 = vmatpush.msra.mxu3 %v2168_v5 }
 0x49a   :  { %v853_v29 = vpop.f32.mrf.mxu2  ;;  %1131 = vmatpush.msra.mxu3 %v2162_v26 }
 0x49b   :  { %v854_v30 = vadd.f32 %v2264_v14, %v853_v29  ;;  %v2156_v29 = vld [vmem:[%s3709_s2 + $0x118] sm:$0xff] }
 0x49c   :  { %1132 = vmatpush.msra.mxu3 %v2156_v29 }
 0x49d   :  { %v857_v31 = vmax.f32 %v854_v30, 0.0 }
 0x49f   :  { %2144 = vmatmul.msk.f32.gmra.mxu3 %vm870_vm7, %v857_v31 }
 0x51a   :  { %v894_v33 = vpop.f32.mrf.mxu3 }
 0x51b   :  { %v895_v34 = vadd.f32 %v2265_v32, %v894_v33  ;;  %v2147_v33 = vld [vmem:[%s3709_s2 + $0xd0] sm:$0xff] }
 0x51d   :  { %v3186_v35 = vadd.f32 %v895_v34, %v817_v17  ;;  %v2150_v34 = vld [vmem:[%s3709_s2 + $0xe8] sm:$0xff] }
 0x51e   :  { %1133 = vmatpush.msra.mxu3 %v2150_v34 }
 0x51f   :  { %v904_v36 = vsel %vm282_vm0, %v3186_v35, 0.0  ;;  %v912_v37 = vmul.f32 %v3186_v35, %v3186_v35 }
 0x520   :  { %905 = vadd.xlane.f32.xlu0 %v904_v36 }
 0x521   :  { %v914_v39 = vsel %vm282_vm0, %v912_v37, 0.0 }
 0x522   :  { %915 = vadd.xlane.f32.xlu1 %v914_v39  ;;  %v897_v40 = vpop.f32.mrf.mxu3 }
 0x523   :  { %v898_v41 = vadd.f32 %v2265_v32, %v897_v40 }
 0x525   :  { %v3193_v42 = vadd.f32 %v898_v41, %v818_v23  ;;  %v2165_v23 = vld [vmem:[%s3709_s2 + $0x160] sm:$0xff] }
 0x526   :  { %1061 = vmatpush.msra.mxu2 %v2165_v23 }
 0x527   :  { %v907_v43 = vsel %vm282_vm0, %v3193_v42, 0.0  ;;  %v913_v44 = vmul.f32 %v3193_v42, %v3193_v42 }
 0x528   :  { %908 = vadd.xlane.f32.xlu2 %v907_v43  ;;  %1062 = vmatpush.msra.mxu2 %v2159_v21 }
 0x529   :  { %v917_v46 = vsel %vm282_vm0, %v913_v44, 0.0 }
 0x52a   :  { %918 = vadd.xlane.f32.xlu0 %v917_v46  ;;  %1063 = vmatpush.msra.mxu2 %v2153_v28 }
 0x52c   :  { %1064 = vmatpush.msra.mxu2 %v2147_v33 }
 0x593   :  { %v906_v47 = vpop.xlane.xlu0 %905 }
 0x594   :  { %v3201_v48 = vmul.f32 %v906_v47, %v3144_v25 }
 0x595   :  { %v916_v49 = vpop.xlane.xlu1 %915 }
 0x596   :  { %v922_v50 = vmul.f32 %v3201_v48, %v3201_v48  ;;  %v920_v51 = vmul.f32 %v916_v49, %v3144_v25  ;;  %v954_v47 = vsub.f32 %v3186_v35, %v3201_v48 }
 0x598   :  { %v924_v52 = vsub.f32 %v920_v51, %v922_v50  ;;  %v2266_v50 = vld [vmem:[#allocation13] ss:$0 sm:$0xff] }
 0x59a   :  { %v926_v53 = vmax.f32 %v924_v52, 0.0 }
 0x59b   :  { %v909_v55 = vpop.xlane.xlu2 %908 }
 0x59c   :  { %v3206_v54 = vmul.f32 1.032258, %v926_v53  ;;  %v3218_v59 = vmul.f32 %v909_v55, %v3144_v25  ;;  %v2267_v55 = vld [vmem:[#allocation14] ss:$0 sm:$0xff] }
 0x59d   :  { %v919_v61 = vpop.xlane.xlu0 %918 }
 0x59e   :  { %2304 = vrsqrt.f32 %v3206_v54  ;;  %v923_v1 = vmul.f32 %v3218_v59, %v3218_v59  ;;  %v921_v2 = vmul.f32 %v919_v61, %v3144_v25  ;;  %vm937_vm8 = vcmp.eq.f32.partialorder %v3206_v54, inf }
 0x59f   :  { %v940_v31 = vand.u32 2147483648, %v3206_v54  ;;  %vm939_vm9 = vcmp.eq.f32.partialorder %v3206_v54, 0.0  ;;  %v955_v35 = vsub.f32 %v3193_v42, %v3218_v59 }
 0x5a0   :  { %v925_v10 = vsub.f32 %v921_v2, %v923_v1 }
 0x5a2   :  { %v927_v15 = vmax.f32 %v925_v10, 0.0 }
 0x5a4   :  { %v2305_v16 = vpop.eup %2304  ;;  %v929_v18 = vmul.f32 1.032258, %v927_v15 }
 0x5a5   :  { %v931_v17 = vmul.f32 %v2305_v16, %v3206_v54 }
 0x5a6   :  { %2306 = vrsqrt.f32 %v929_v18  ;;  %vm949_vm10 = vcmp.eq.f32.partialorder %v929_v18, inf  ;;  %v952_v46 = vand.u32 2147483648, %v929_v18  ;;  %vm951_vm11 = vcmp.eq.f32.partialorder %v929_v18, 0.0 }
 0x5a7   :  { %v932_v19 = vmul.f32 %v2305_v16, %v931_v17 }
 0x5a9   :  { %v933_v20 = vmul.f32 0.5, %v932_v19 }
 0x5ab   :  { %v934_v22 = vsub.f32 1.5, %v933_v20 }
 0x5ac   :  { %v2307_v24 = vpop.eup %2306 }
 0x5ad   :  { %v935_v14 = vmul.f32 %v2305_v16, %v934_v22  ;;  %v943_v27 = vmul.f32 %v2307_v24, %v929_v18 }
 0x5af   :  { %v936_v30 = vmul.f32 %v935_v14, %v3206_v54  ;;  %v944_v32 = vmul.f32 %v2307_v24, %v943_v27 }
 0x5b1   :  { %v938_v36 = vsel %vm937_vm8, %v3206_v54, %v936_v30  ;;  %v945_v39 = vmul.f32 0.5, %v944_v32 }
 0x5b2   :  { %v941_v37 = vsel %vm939_vm9, %v940_v31, %v938_v36 }
 0x5b3   :  { %v956_v40 = vadd.f32 0.001, %v941_v37  ;;  %v946_v41 = vsub.f32 1.5, %v945_v39 }
 0x5b5   :  { %2308 = vrcp.f32 %v956_v40  ;;  %v947_v43 = vmul.f32 %v2307_v24, %v946_v41 }
 0x5b7   :  { %v948_v44 = vmul.f32 %v947_v43, %v929_v18 }
 0x5b9   :  { %v950_v49 = vsel %vm949_vm10, %v929_v18, %v948_v44 }
 0x5ba   :  { %v953_v52 = vsel %vm951_vm11, %v952_v46, %v950_v49  ;;  %v2199_v49 = vld [vmem:[%s3711_s10 + $0x170] sm:$0xff] }
 0x5bb   :  { %v2309_v51 = vpop.eup %2308  ;;  %v957_v53 = vadd.f32 0.001, %v953_v52  ;;  %v2215_v52 = vld [vmem:[%s3711_s10 + $0x1f0] sm:$0xff] }
 0x5bc   :  { %v960_v54 = vmul.f32 %v2309_v51, %v954_v47  ;;  %v2200_v47 = vld [vmem:[%s3711_s10 + $0x178] sm:$0xff]  ;;  %v2198_v51 = vld [vmem:[%s3711_s10 + $0x168] sm:$0xff] }
 0x5bd   :  { %2310 = vrcp.f32 %v957_v53  ;;  %v2214_v53 = vld [vmem:[%s3711_s10 + $0x1e8] sm:$0xff] }
 0x5be   :  { %v965_v56 = vmul.f32 %v2266_v50, %v960_v54  ;;  %v2197_v54 = vld [vmem:[%s3711_s10 + $0x160] sm:$0xff] }
 0x5c0   :  { %v3295_v57 = vadd.f32 %v2267_v55, %v965_v56  ;;  %v2196_v56 = vld [vmem:[%s3711_s10 + $0x158] sm:$0xff] }
 0x5c2   :  { %2169 = vmatmul.msk.f32.vlgmr.msrb.gmra.mxu2 %vm282_vm0, %v3295_v57  ;;  %2171 = vmatmul.msk.f32.vlgmr.msrb.gmra.mxu3 %vm282_vm0, %v3295_v57 }
 0x5c3   :  { %2175 = vmatmul.msk.f32.vlgmr.msra.gmra.mxu0 %vm282_vm0, %v3295_v57  ;;  %2177 = vmatmul.msk.f32.vlgmr.msra.gmra.mxu1 %vm282_vm0, %v3295_v57  ;;  %v2311_v48 = vpop.eup %2310 }
 0x5c4   :  { %v961_v58 = vmul.f32 %v2311_v48, %v955_v35  ;;  %v2212_v35 = vld [vmem:[%s3711_s10 + $0x1d8] sm:$0xff]  ;;  %v2195_v48 = vld [vmem:[%s3711_s10 + $0x150] sm:$0xff] }
 0x5c6   :  { %v966_v60 = vmul.f32 %v2266_v50, %v961_v58  ;;  %v2216_v50 = vld [vmem:[%s3711_s10 + $0x1f8] sm:$0xff]  ;;  %v2211_v58 = vld [vmem:[%s3711_s10 + $0x1d0] sm:$0xff] }
 0x5c8   :  { %v3307_v61 = vadd.f32 %v2267_v55, %v966_v60  ;;  %v2213_v55 = vld [vmem:[%s3711_s10 + $0x1e0] sm:$0xff]  ;;  %v2194_v60 = vld [vmem:[%s3711_s10 + $0x148] sm:$0xff] }
 0x5ca   :  { %2170 = vmatmul.msk.f32.gmra.mxu2 %vm282_vm0, %v3307_v61  ;;  %2172 = vmatmul.msk.f32.gmra.mxu3 %vm282_vm0, %v3307_v61 }
 0x5cb   :  { %2176 = vmatmul.msk.f32.gmra.mxu0 %vm282_vm0, %v3307_v61  ;;  %2178 = vmatmul.msk.f32.gmra.mxu1 %vm282_vm0, %v3307_v61 }
 0x5d2   :  { %2173 = vmatmul.msk.f32.vlgmr.msra.gmra.mxu2 %vm282_vm0, %v3295_v57  ;;  %2179 = vmatmul.msk.f32.vlgmr.msra.gmra.mxu3 %vm282_vm0, %v3295_v57 }
 0x5da   :  { %2174 = vmatmul.msk.f32.gmra.mxu2 %vm282_vm0, %v3307_v61  ;;  %2180 = vmatmul.msk.f32.gmra.mxu3 %vm282_vm0, %v3307_v61 }
 0x640   :  { %v1089_v42 = vpop.f32.mrf.mxu0  ;;  %v1112_v59 = vpop.f32.mrf.mxu1 }
 0x641   :  { %1225 = vmatpush.msrb.mxu1 %v1112_v59  ;;  %1268 = vmatpush.xpose.msrb.mxu3 %v1089_v42  ;;  %v2210_v42 = vld [vmem:[%s3711_s10 + $0x1c8] sm:$0xff] }
 0x645   :  { %v1020_v62 = vpop.f32.mrf.mxu2  ;;  %v1043_v63 = vpop.f32.mrf.mxu3  ;;  %1403 = vmatpush.msra.mxu3 %v2200_v47 }
 0x646   :  { %1269 = vmatmul.f32.vlgmr.msrb.gmra.mxu3 %v1043_v63  ;;  %v2209_v63 = vld [vmem:[%s3711_s10 + $0x1c0] sm:$0xff] }
 0x647   :  { %1404 = vmatpush.msra.mxu3 %v2199_v49 }
 0x648   :  { %v1115_v4 = vpop.f32.mrf.mxu1  ;;  %v1092_v8 = vpop.f32.mrf.mxu0 }
 0x649   :  { %1405 = vmatpush.msra.mxu3 %v2198_v51  ;;  %v2220_v51 = vld [vmem:[%s3682_s7 + $0x38] sm:$0xff] }
 0x64b   :  { %1406 = vmatpush.msra.mxu3 %v2197_v54  ;;  %v2217_v54 = vld [vmem:[%s3682_s7 + $0x20] sm:$0xff] }
 0x64d   :  { %v1023_v0 = vpop.f32.mrf.mxu2  ;;  %v1046_v1 = vpop.f32.mrf.mxu3  ;;  %1407 = vmatpush.msra.mxu3 %v2196_v56 }
 0x64f   :  { %1408 = vmatpush.msra.mxu3 %v2195_v48 }
 0x651   :  { %1409 = vmatpush.msra.mxu3 %v2194_v60 }
 0x655   :  { %v1066_v2 = vpop.f32.mrf.mxu2  ;;  %v1135_v3 = vpop.f32.mrf.mxu3 }
 0x656   :  { %1156 = vmatpush.xpose.msrb.mxu2 %v1066_v2  ;;  %1337 = vmatpush.msra.mxu1 %v1135_v3  ;;  %v2208_v2 = vld [vmem:[%s3711_s10 + $0x1b8] sm:$0xff] }
 0x659   :  { %1157 = vmatmul.f32.vlgmr.msrb.gmra.mxu2 %v1020_v62  ;;  %v2193_v62 = vld [vmem:[%s3711_s10 + $0x140] sm:$0xff] }
 0x65a   :  { %1248 = vmatpush.msra.mxu2 %v1115_v4  ;;  %1410 = vmatpush.msra.mxu3 %v2193_v62  ;;  %v2191_v4 = vld [vmem:[%s3711_s10 + $0x130] sm:$0xff] }
 0x65d   :  { %v1069_v6 = vpop.f32.mrf.mxu2  ;;  %v1138_v7 = vpop.f32.mrf.mxu3 }
 0x65e   :  { %1176 = vmatpush.xpose.msrb.mxu0 %v1069_v6  ;;  %1360 = vmatpush.msrb.mxu2 %v1138_v7  ;;  %v2207_v6 = vld [vmem:[%s3711_s10 + $0x1b0] sm:$0xff]  ;;  %v2190_v7 = vld [vmem:[%s3711_s10 + $0x128] sm:$0xff] }
 0x661   :  { %1177 = vmatmul.f32.vlgmr.msrb.gmra.mxu0 %v1023_v0 }
 0x662   :  { %1288 = vmatpush.xpose.msra.mxu0 %v1092_v8 }
 0x666   :  { %1426 = vmatpush.msrb.mxu0 %v2216_v50 }
 0x668   :  { %1427 = vmatpush.msrb.mxu0 %v2215_v52  ;;  %v2219_v52 = vld [vmem:[%s3682_s7 + $0x30] sm:$0xff] }
 0x669   :  { %1289 = vmatmul.f32.vlgmr.msra.gmra.mxu0 %v1046_v1  ;;  %v2192_v1 = vld [vmem:[%s3711_s10 + $0x138] sm:$0xff] }
 0x66a   :  { %1428 = vmatpush.msrb.mxu0 %v2214_v53  ;;  %1411 = vmatpush.msra.mxu3 %v2192_v1 }
 0x66c   :  { %1429 = vmatpush.msrb.mxu0 %v2213_v55  ;;  %1412 = vmatpush.msra.mxu3 %v2191_v4 }
 0x66e   :  { %1430 = vmatpush.msrb.mxu0 %v2212_v35  ;;  %1413 = vmatpush.msra.mxu3 %v2190_v7 }
 0x670   :  { %1431 = vmatpush.msrb.mxu0 %v2211_v58 }
 0x672   :  { %1432 = vmatpush.msrb.mxu0 %v2210_v42 }
 0x674   :  { %1433 = vmatpush.msrb.mxu0 %v2209_v63 }
 0x676   :  { %1434 = vmatpush.msrb.mxu0 %v2208_v2 }
 0x678   :  { %1435 = vmatpush.msrb.mxu0 %v2207_v6 }
 0x6c9   :  { %v1270_v9 = vpop.f32.mrf.mxu3 }
 0x6ca   :  { %v1293_v10 = vmul.f32 0.17677669, %v1270_v9  ;;  %v2206_v9 = vld [vmem:[%s3711_s10 + $0x1a8] sm:$0xff] }
 0x6cb   :  { %1436 = vmatpush.msrb.mxu0 %v2206_v9 }
 0x6cc   :  { %v1295_v11 = vadd.f32 %v2995_v38, %v1293_v10 }
 0x6ce   :  { %v1297_v13 = vsel %vm477_vm1, %v1295_v11, -inf }
 0x6cf   :  { %1298 = vmax.xlane.f32.xlu0 %v1297_v13 }
 0x6dc   :  { %v1158_v12 = vpop.f32.mrf.mxu2 }
 0x6dd   :  { %v1181_v15 = vmul.f32 0.17677669, %v1158_v12 }
 0x6de   :  { %v1178_v16 = vpop.f32.mrf.mxu0 }
 0x6df   :  { %v1182_v17 = vmul.f32 0.17677669, %v1178_v16  ;;  %v1183_v18 = vadd.f32 %v2995_v38, %v1181_v15  ;;  %v2188_v16 = vld [vmem:[%s3711_s10 + $0x118] sm:$0xff] }
 0x6e1   :  { %v1185_v19 = vsel %vm477_vm1, %v1183_v18, -inf  ;;  %v1184_v20 = vadd.f32 %v3002_v45, %v1182_v17  ;;  %v2187_v17 = vld [vmem:[%s3711_s10 + $0x110] sm:$0xff] }
 0x6e2   :  { %1186 = vmax.xlane.f32.xlu1 %v1185_v19  ;;  %v2186_v19 = vld [vmem:[%s3711_s10 + $0x108] sm:$0xff] }
 0x6e3   :  { %v1188_v22 = vsel %vm477_vm1, %v1184_v20, -inf }
 0x6e4   :  { %1189 = vmax.xlane.f32.xlu2 %v1188_v22 }
 0x6e6   :  { %v1290_v23 = vpop.f32.mrf.mxu0 }
 0x6e7   :  { %v1294_v5 = vmul.f32 0.17677669, %v1290_v23 }
 0x6e9   :  { %v1296_v21 = vadd.f32 %v3002_v45, %v1294_v5  ;;  %v2185_v5 = vld [vmem:[%s3711_s10 + $0x100] sm:$0xff] }
 0x6eb   :  { %v1300_v24 = vsel %vm477_vm1, %v1296_v21, -inf }
 0x6ec   :  { %1301 = vmax.xlane.f32.xlu1 %v1300_v24  ;;  %v2204_v24 = vld [vmem:[%s3711_s10 + $0x198] sm:$0xff] }
 0x742   :  { %v1299_v14 = vpop.xlane.xlu0 %1298 }
 0x743   :  { %v1303_v26 = vsub.f32 %v1295_v11, %v1299_v14  ;;  %v2189_v11 = vld [vmem:[%s3711_s10 + $0x120] sm:$0xff]  ;;  %v2203_v14 = vld [vmem:[%s3711_s10 + $0x190] sm:$0xff] }
 0x744   :  { %1414 = vmatpush.msra.mxu3 %v2189_v11  ;;  %v2230_v11 = vld [vmem:[%s3684_s9 + $0x78] sm:$0xff] }
 0x745   :  { %v1305_v27 = vmul.f32 1.442695, %v1303_v26  ;;  %v2202_v26 = vld [vmem:[%s3711_s10 + $0x188] sm:$0xff] }
 0x746   :  { %1415 = vmatpush.msra.mxu3 %v2188_v16  ;;  %v2228_v16 = vld [vmem:[%s3684_s9 + $0x68] sm:$0xff] }
 0x747   :  { %2312 = vpow2.f32 %v1305_v27  ;;  %v2201_v27 = vld [vmem:[%s3711_s10 + $0x180] sm:$0xff] }
 0x748   :  { %1416 = vmatpush.msra.mxu3 %v2187_v17 }
 0x74a   :  { %1417 = vmatpush.msra.mxu3 %v2186_v19  ;;  %v2227_v19 = vld [vmem:[%s3684_s9 + $0x60] sm:$0xff] }
 0x74c   :  { %1418 = vmatpush.msra.mxu3 %v2185_v5  ;;  %v2226_v5 = vld [vmem:[%s3684_s9 + $0x58] sm:$0xff] }
 0x74d   :  { %v3333_v38 = vpop.eup %2312 }
 0x74e   :  { %v1309_v28 = vsel %vm477_vm1, %v3333_v38, 0.0 }
 0x74f   :  { %1310 = vadd.xlane.f32.xlu1 %v1309_v28 }
 0x755   :  { %v1187_v29 = vpop.xlane.xlu1 %1186 }
 0x756   :  { %v1191_v30 = vsub.f32 %v1183_v18, %v1187_v29 }
 0x757   :  { %v1190_v31 = vpop.xlane.xlu2 %1189 }
 0x758   :  { %v1193_v32 = vmul.f32 1.442695, %v1191_v30  ;;  %v1192_v33 = vsub.f32 %v1184_v20, %v1190_v31  ;;  %v2268_v31 = vld [vmem:[#allocation5 + $0x1] ss:$0 sm:$0xff] }
 0x75a   :  { %2314 = vpow2.f32 %v1193_v32  ;;  %v1195_v45 = vmul.f32 1.442695, %v1192_v33 }
 0x75c   :  { %2316 = vpow2.f32 %v1195_v45 }
 0x75f   :  { %v1302_v34 = vpop.xlane.xlu1 %1301 }
 0x760   :  { %v2315_v36 = vpop.eup %2314  ;;  %v1304_v37 = vsub.f32 %v1296_v21, %v1302_v34  ;;  %v2205_v21 = vld [vmem:[%s3711_s10 + $0x1a0] sm:$0xff] }
 0x761   :  { %v1197_v39 = vsel %vm477_vm1, %v2315_v36, 0.0  ;;  %1437 = vmatpush.msrb.mxu0 %v2205_v21 }
 0x762   :  { %v2317_v40 = vpop.eup %2316  ;;  %v1307_v41 = vmul.f32 1.442695, %v1304_v37  ;;  %1198 = vadd.xlane.f32.xlu2 %v1197_v39 }
 0x763   :  { %v1200_v43 = vsel %vm477_vm1, %v2317_v40, 0.0  ;;  %1438 = vmatpush.msrb.mxu0 %v2204_v24 }
 0x764   :  { %2318 = vpow2.f32 %v1307_v41  ;;  %1201 = vadd.xlane.f32.xlu0 %v1200_v43 }
 0x765   :  { %1439 = vmatpush.msrb.mxu0 %v2203_v14 }
 0x767   :  { %1440 = vmatpush.msrb.mxu0 %v2202_v26 }
 0x769   :  { %1441 = vmatpush.msrb.mxu0 %v2201_v27 }
 0x76a   :  { %v3339_v44 = vpop.eup %2318 }
 0x76b   :  { %v1312_v46 = vsel %vm477_vm1, %v3339_v44, 0.0 }
 0x76c   :  { %1313 = vadd.xlane.f32.xlu2 %v1312_v46 }
 0x7c2   :  { %v1311_v3 = vpop.xlane.xlu1 %1310 }
 0x7d5   :  { %v1199_v59 = vpop.xlane.xlu2 %1198 }
 0x7d6   :  { %2320 = vrcp.f32 %v1199_v59 }
 0x7d7   :  { %v1202_v0 = vpop.xlane.xlu0 %1201 }
 0x7d8   :  { %2322 = vrcp.f32 %v1202_v0 }
 0x7d9   :  { %2324 = vrcp.f32 %v1311_v3 }
 0x7dc   :  { %v2321_v8 = vpop.eup %2320 }
 0x7dd   :  { %v1205_v10 = vmul.f32 %v2321_v8, %v2315_v36 }
 0x7de   :  { %v2323_v13 = vpop.eup %2322 }
 0x7df   :  { %v1206_v12 = vmul.f32 %v2323_v13, %v2317_v40  ;;  %2181 = vmatmul.msk.f32.vlgmr.msrb.gmra.mxu1 %vm477_vm1, %v1205_v10  ;;  %v1314_v15 = vpop.xlane.xlu2 %1313  ;;  %v2325_v18 = vpop.eup %2324  ;;  %v2229_v13 = vld [vmem:[%s3684_s9 + $0x70] sm:$0xff] }
 0x7e0   :  { %2326 = vrcp.f32 %v1314_v15  ;;  %v1317_v20 = vmul.f32 %v2325_v18, %v3333_v38  ;;  %1551 = vmatpush.msrb.mxu1 %v2220_v51 }
 0x7e1   :  { %2182 = vmatmul.msk.f32.vlgmr.msra.gmra.mxu2 %vm477_vm1, %v1206_v12 }
 0x7e2   :  { %1552 = vmatpush.msrb.mxu1 %v2219_v52  ;;  %1592 = vmatpush.msra.mxu2 %v2230_v11 }
 0x7e4   :  { %1593 = vmatpush.msra.mxu2 %v2229_v13 }
 0x7e6   :  { %v2327_v22 = vpop.eup %2326  ;;  %1594 = vmatpush.msra.mxu2 %v2228_v16  ;;  %v1715_v16 = vld [vmem:[#allocation16 + $0xa0] sm:$0xff] }
 0x7e7   :  { %v1318_v23 = vmul.f32 %v2327_v22, %v3339_v44  ;;  %2183 = vmatmul.msk.f32.vlgmr.msra.gmra.mxu1 %vm477_vm1, %v1317_v20 }
 0x7e8   :  { %1595 = vmatpush.msra.mxu2 %v2227_v19  ;;  %v1707_v19 = vld [vmem:[#allocation16 + $0x60] sm:$0xff] }
 0x7e9   :  { %2184 = vmatmul.msk.f32.vlgmr.msrb.gmra.mxu2 %vm477_vm1, %v1318_v23 }
 0x7ea   :  { %1596 = vmatpush.msra.mxu2 %v2226_v5  ;;  %v1701_v5 = vld [vmem:[#allocation16 + $0x30] sm:$0xff] }
 0x85c   :  { %v1227_v38 = vpop.f32.mrf.mxu1 }
 0x85d   :  { %1419 = vmatmul.f32.vlgmr.msra.gmra.mxu3 %v1227_v38 }
 0x864   :  { %v1250_v28 = vpop.f32.mrf.mxu2  ;;  %v1339_v29 = vpop.f32.mrf.mxu1 }
 0x865   :  { %1422 = vmatmul.f32.gmra.mxu3 %v1250_v28  ;;  %1442 = vmatmul.f32.vlgmr.msrb.gmra.mxu0 %v1339_v29 }
 0x86c   :  { %v1362_v30 = vpop.f32.mrf.mxu2 }
 0x86d   :  { %1445 = vmatmul.f32.gmra.mxu0 %v1362_v30  ;;  %v2269_v30 = vld [vmem:[#allocation7 + $0x1] ss:$0 sm:$0xff] }
 0x8e0   :  { %v1420_v32 = vpop.f32.mrf.mxu3 }
 0x8e1   :  { %v1421_v33 = vadd.f32 %v2268_v31, %v1420_v32 }
 0x8e2   :  { %v1443_v45 = vpop.f32.mrf.mxu0 }
 0x8e3   :  { %v1444_v34 = vadd.f32 %v1443_v45, %v1421_v33 }
 0x8e5   :  { %v3446_v36 = vadd.f32 %v1444_v34, %v3295_v57  ;;  %v2270_v34 = vld [vmem:[#allocation8 + $0x1] ss:$0 sm:$0xff] }
 0x8e7   :  { %v1455_v37 = vsel %vm282_vm0, %v3446_v36, 0.0  ;;  %v1463_v39 = vmul.f32 %v3446_v36, %v3446_v36 }
 0x8e8   :  { %v1423_v40 = vpop.f32.mrf.mxu3  ;;  %1456 = vadd.xlane.f32.xlu0 %v1455_v37 }
 0x8e9   :  { %v1424_v41 = vadd.f32 %v2268_v31, %v1423_v40  ;;  %v1465_v43 = vsel %vm282_vm0, %v1463_v39, 0.0 }
 0x8ea   :  { %v1446_v44 = vpop.f32.mrf.mxu0  ;;  %1466 = vadd.xlane.f32.xlu1 %v1465_v43 }
 0x8eb   :  { %v1447_v46 = vadd.f32 %v1446_v44, %v1424_v41 }
 0x8ed   :  { %v3454_v47 = vadd.f32 %v1447_v46, %v3307_v61  ;;  %v2218_v61 = vld [vmem:[%s3682_s7 + $0x28] sm:$0xff] }
 0x8ee   :  { %1553 = vmatpush.msrb.mxu1 %v2218_v61 }
 0x8ef   :  { %v1458_v57 = vsel %vm282_vm0, %v3454_v47, 0.0  ;;  %v1464_v49 = vmul.f32 %v3454_v47, %v3454_v47 }
 0x8f0   :  { %1459 = vadd.xlane.f32.xlu2 %v1458_v57  ;;  %1554 = vmatpush.msrb.mxu1 %v2217_v54 }
 0x8f1   :  { %v1468_v50 = vsel %vm282_vm0, %v1464_v49, 0.0  ;;  %v2224_v49 = vld [vmem:[%s3684_s9 + $0x48] sm:$0xff] }
 0x8f2   :  { %1469 = vadd.xlane.f32.xlu0 %v1468_v50  ;;  %v2223_v50 = vld [vmem:[%s3684_s9 + $0x40] sm:$0xff] }
 0x95b   :  { %v1457_v53 = vpop.xlane.xlu0 %1456 }
 0x95c   :  { %v1461_v55 = vmul.f32 %v1457_v53, %v3144_v25 }
 0x95d   :  { %v1467_v56 = vpop.xlane.xlu1 %1466 }
 0x95e   :  { %v1473_v35 = vmul.f32 %v1461_v55, %v1461_v55  ;;  %v1471_v48 = vmul.f32 %v1467_v56, %v3144_v25  ;;  %v1505_v29 = vsub.f32 %v3446_v36, %v1461_v55  ;;  %v2225_v36 = vld [vmem:[%s3684_s9 + $0x50] sm:$0xff]  ;;  %v2272_v56 = vld [vmem:[#allocation11 + $0x1] ss:$0 sm:$0xff] }
 0x95f   :  { %1597 = vmatpush.msra.mxu2 %v2225_v36 }
 0x960   :  { %v1475_v58 = vsub.f32 %v1471_v48, %v1473_v35 }
 0x961   :  { %1598 = vmatpush.msra.mxu2 %v2224_v49 }
 0x962   :  { %v1477_v60 = vmax.f32 %v1475_v58, 0.0 }
 0x963   :  { %v1460_v42 = vpop.xlane.xlu2 %1459  ;;  %1599 = vmatpush.msra.mxu2 %v2223_v50 }
 0x964   :  { %v1479_v59 = vmul.f32 1.032258, %v1477_v60  ;;  %v1462_v62 = vmul.f32 %v1460_v42, %v3144_v25 }
 0x965   :  { %v1470_v63 = vpop.xlane.xlu0 %1469  ;;  %1791 = vmatpush.msrb.mxu2 %v1715_v16 }
 0x966   :  { %2328 = vrsqrt.f32 %v1479_v59  ;;  %v1474_v0 = vmul.f32 %v1462_v62, %v1462_v62  ;;  %v1472_v1 = vmul.f32 %v1470_v63, %v3144_v25  ;;  %vm1488_vm12 = vcmp.eq.f32.partialorder %v1479_v59, inf }
 0x967   :  { %v1491_v20 = vand.u32 2147483648, %v1479_v59  ;;  %vm1490_vm13 = vcmp.eq.f32.partialorder %v1479_v59, 0.0  ;;  %v1506_v41 = vsub.f32 %v3454_v47, %v1462_v62  ;;  %v2271_v47 = vld [vmem:[#allocation10 + $0x1] ss:$0 sm:$0xff] }
 0x968   :  { %v1476_v2 = vsub.f32 %v1472_v1, %v1474_v0 }
 0x96a   :  { %v1478_v3 = vmax.f32 %v1476_v2, 0.0 }
 0x96c   :  { %v2329_v4 = vpop.eup %2328  ;;  %v1480_v7 = vmul.f32 1.032258, %v1478_v3 }
 0x96d   :  { %v1482_v6 = vmul.f32 %v2329_v4, %v1479_v59 }
 0x96e   :  { %2330 = vrsqrt.f32 %v1480_v7  ;;  %vm1500_vm14 = vcmp.eq.f32.partialorder %v1480_v7, inf  ;;  %v1503_v28 = vand.u32 2147483648, %v1480_v7  ;;  %vm1502_vm15 = vcmp.eq.f32.partialorder %v1480_v7, 0.0 }
 0x96f   :  { %v1483_v8 = vmul.f32 %v2329_v4, %v1482_v6 }
 0x971   :  { %v1484_v9 = vmul.f32 0.5, %v1483_v8 }
 0x973   :  { %v1485_v10 = vsub.f32 1.5, %v1484_v9 }
 0x974   :  { %v2331_v12 = vpop.eup %2330 }
 0x975   :  { %v1486_v15 = vmul.f32 %v2329_v4, %v1485_v10  ;;  %v1494_v17 = vmul.f32 %v2331_v12, %v1480_v7 }
 0x977   :  { %v1487_v18 = vmul.f32 %v1486_v15, %v1479_v59  ;;  %v1495_v22 = vmul.f32 %v2331_v12, %v1494_v17  ;;  %v1713_v15 = vld [vmem:[#allocation16 + $0x90] sm:$0xff]  ;;  %v1718_v17 = vld [vmem:[#allocation16 + $0xb8] sm:$0xff] }
 0x978   :  { %1751 = vmatpush.msra.mxu1 %v1713_v15  ;;  %1851 = vmatpush.msrb.mxu3 %v1718_v17 }
 0x979   :  { %v1489_v23 = vsel %vm1488_vm12, %v1479_v59, %v1487_v18  ;;  %v1496_v24 = vmul.f32 0.5, %v1495_v22  ;;  %v1712_v22 = vld [vmem:[#allocation16 + $0x88] sm:$0xff] }
 0x97a   :  { %v1492_v21 = vsel %vm1490_vm13, %v1491_v20, %v1489_v23  ;;  %v1709_v20 = vld [vmem:[#allocation16 + $0x70] sm:$0xff]  ;;  %1752 = vmatpush.msra.mxu1 %v1707_v19  ;;  %1852 = vmatpush.msrb.mxu3 %v1712_v22 }
 0x97b   :  { %v1507_v14 = vadd.f32 0.001, %v1492_v21  ;;  %v1497_v26 = vsub.f32 1.5, %v1496_v24  ;;  %v1703_v21 = vld [vmem:[#allocation16 + $0x40] sm:$0xff]  ;;  %1792 = vmatpush.msrb.mxu2 %v1709_v20 }
 0x97c   :  { %1753 = vmatpush.msra.mxu1 %v1701_v5 }
 0x97d   :  { %2332 = vrcp.f32 %v1507_v14  ;;  %v1498_v27 = vmul.f32 %v2331_v12, %v1497_v26  ;;  %v1706_v26 = vld [vmem:[#allocation16 + $0x58] sm:$0xff]  ;;  %1793 = vmatpush.msrb.mxu2 %v1703_v21 }
 0x97e   :  { %1853 = vmatpush.msrb.mxu3 %v1706_v26 }
 0x97f   :  { %v1499_v38 = vmul.f32 %v1498_v27, %v1480_v7  ;;  %v1695_v27 = vld [vmem:[#allocation16] sm:$0xff] }
 0x980   :  { %1754 = vmatpush.msra.mxu1 %v1695_v27  ;;  %v1710_v27 = vld [vmem:[#allocation16 + $0x78] sm:$0xff] }
 0x981   :  { %v1501_v31 = vsel %vm1500_vm14, %v1480_v7, %v1499_v38  ;;  %v1697_v38 = vld [vmem:[#allocation16 + $0x10] sm:$0xff] }
 0x982   :  { %v1504_v33 = vsel %vm1502_vm15, %v1503_v28, %v1501_v31  ;;  %1794 = vmatpush.msrb.mxu2 %v1697_v38  ;;  %v1704_v38 = vld [vmem:[#allocation16 + $0x48] sm:$0xff] }
 0x983   :  { %v2333_v32 = vpop.eup %2332  ;;  %v1508_v37 = vadd.f32 0.001, %v1504_v33 }
 0x984   :  { %v1511_v45 = vmul.f32 %v2333_v32, %v1505_v29  ;;  %v1700_v29 = vld [vmem:[#allocation16 + $0x28] sm:$0xff] }
 0x985   :  { %2334 = vrcp.f32 %v1508_v37  ;;  %1854 = vmatpush.msrb.mxu3 %v1700_v29  ;;  %v1958_v29 = vld [vmem:[%s3690_s15 + $0x78] sm:$0xff] }
 0x986   :  { %v1516_v39 = vmul.f32 %v2269_v30, %v1511_v45  ;;  %1979 = vmatpush.msra.mxu0 %v1958_v29 }
 0x988   :  { %v1521_v40 = vadd.f32 %v2270_v34, %v1516_v39 }
 0x98a   :  { %2221 = vmatmul.msk.f32.vlgmr.msrb.gmra.mxu1 %vm282_vm0, %v1521_v40 }
 0x98b   :  { %v2335_v43 = vpop.eup %2334 }
 0x98c   :  { %v1512_v44 = vmul.f32 %v2335_v43, %v1506_v41 }
 0x98e   :  { %v1517_v46 = vmul.f32 %v2269_v30, %v1512_v44 }
 0x990   :  { %v1522_v57 = vadd.f32 %v2270_v34, %v1517_v46 }
 0x992   :  { %2222 = vmatmul.msk.f32.gmra.mxu1 %vm282_vm0, %v1522_v57 }
 0xa07   :  { %v1556_v51 = vpop.f32.mrf.mxu1 }
 0xa08   :  { %v1557_v52 = vadd.f32 %v2271_v47, %v1556_v51 }
 0xa0a   :  { %v1562_v61 = vmax.f32 %v1557_v52, 0.0 }
 0xa0c   :  { %2231 = vmatmul.msk.f32.vlgmr.msra.gmra.mxu2 %vm870_vm7, %v1562_v61  ;;  %v2273_v61 = vld [vmem:[#allocation13 + $0x1] ss:$0 sm:$0xff] }
 0xa0f   :  { %v1559_v53 = vpop.f32.mrf.mxu1 }
 0xa10   :  { %v1560_v54 = vadd.f32 %v2271_v47, %v1559_v53 }
 0xa12   :  { %v1563_v55 = vmax.f32 %v1560_v54, 0.0 }
 0xa14   :  { %2232 = vmatmul.msk.f32.gmra.mxu2 %vm870_vm7, %v1563_v55  ;;  %v1714_v55 = vld [vmem:[#allocation16 + $0x98] sm:$0xff] }
 0xa15   :  { %1771 = vmatpush.msrb.mxu1 %v1714_v55  ;;  %v1946_v55 = vld [vmem:[%s3690_s15 + $0x18] sm:$0xff] }
 0xa8f   :  { %v1601_v35 = vpop.f32.mrf.mxu2 }
 0xa90   :  { %v1602_v48 = vadd.f32 %v2272_v56, %v1601_v35  ;;  %v1708_v35 = vld [vmem:[#allocation16 + $0x68] sm:$0xff] }
 0xa91   :  { %1772 = vmatpush.msrb.mxu1 %v1708_v35 }
 0xa92   :  { %v3507_v58 = vadd.f32 %v1602_v48, %v1521_v40 }
 0xa94   :  { %v1613_v60 = vsel %vm282_vm0, %v3507_v58, 0.0  ;;  %v1621_v42 = vmul.f32 %v3507_v58, %v3507_v58 }
 0xa95   :  { %1614 = vadd.xlane.f32.xlu1 %v1613_v60 }
 0xa96   :  { %v1623_v59 = vsel %vm282_vm0, %v1621_v42, 0.0  ;;  %v1711_v42 = vld [vmem:[#allocation16 + $0x80] sm:$0xff] }
 0xa97   :  { %1624 = vadd.xlane.f32.xlu0 %v1623_v59  ;;  %v1604_v62 = vpop.f32.mrf.mxu2 }
 0xa98   :  { %v1605_v63 = vadd.f32 %v2272_v56, %v1604_v62  ;;  %v1717_v56 = vld [vmem:[#allocation16 + $0xb0] sm:$0xff] }
 0xa99   :  { %1831 = vmatpush.msra.mxu2 %v1717_v56  ;;  %v1970_v56 = vld [vmem:[%s3690_s15 + $0xd8] sm:$0xff] }
 0xa9a   :  { %v3514_v0 = vadd.f32 %v1605_v63, %v1522_v57  ;;  %v2274_v63 = vld [vmem:[#allocation14 + $0x1] ss:$0 sm:$0xff] }
 0xa9b   :  { %1832 = vmatpush.msra.mxu2 %v1711_v42 }
 0xa9c   :  { %v1616_v1 = vsel %vm282_vm0, %v3514_v0, 0.0  ;;  %v1622_v2 = vmul.f32 %v3514_v0, %v3514_v0 }
 0xa9d   :  { %1617 = vadd.xlane.f32.xlu2 %v1616_v1  ;;  %v1702_v1 = vld [vmem:[#allocation16 + $0x38] sm:$0xff] }
 0xa9e   :  { %v1626_v3 = vsel %vm282_vm0, %v1622_v2, 0.0  ;;  %v1705_v2 = vld [vmem:[#allocation16 + $0x50] sm:$0xff]  ;;  %1773 = vmatpush.msrb.mxu1 %v1702_v1 }
 0xa9f   :  { %1627 = vadd.xlane.f32.xlu1 %v1626_v3  ;;  %1833 = vmatpush.msra.mxu2 %v1705_v2  ;;  %v1944_v2 = vld [vmem:[%s3690_s15 + $0x8] sm:$0xff] }
 0xb08   :  { %v1615_v4 = vpop.xlane.xlu1 %1614 }
 0xb09   :  { %v3522_v6 = vmul.f32 %v1615_v4, %v3144_v25  ;;  %v1699_v4 = vld [vmem:[#allocation16 + $0x20] sm:$0xff] }
 0xb0a   :  { %v1625_v7 = vpop.xlane.xlu0 %1624  ;;  %1834 = vmatpush.msra.mxu2 %v1699_v4  ;;  %v1943_v4 = vld [vmem:[%s3690_s15] sm:$0xff] }
 0xb0b   :  { %v1631_v8 = vmul.f32 %v3522_v6, %v3522_v6  ;;  %v1629_v9 = vmul.f32 %v1625_v7, %v3144_v25  ;;  %v1663_v53 = vsub.f32 %v3507_v58, %v3522_v6  ;;  %v1696_v58 = vld [vmem:[#allocation16 + $0x8] sm:$0xff] }
 0xb0c   :  { %1774 = vmatpush.msrb.mxu1 %v1696_v58 }
 0xb0d   :  { %v1633_v10 = vsub.f32 %v1629_v9, %v1631_v8 }
 0xb0f   :  { %v1635_v11 = vmax.f32 %v1633_v10, 0.0 }
 0xb10   :  { %v1618_v12 = vpop.xlane.xlu2 %1617 }
 0xb11   :  { %v1637_v13 = vmul.f32 1.032258, %v1635_v11  ;;  %v3528_v18 = vmul.f32 %v1618_v12, %v3144_v25 }
 0xb12   :  { %v1628_v23 = vpop.xlane.xlu1 %1627 }
 0xb13   :  { %2336 = vrsqrt.f32 %v1637_v13  ;;  %v1632_v24 = vmul.f32 %v3528_v18, %v3528_v18  ;;  %v1630_v14 = vmul.f32 %v1628_v23, %v3144_v25  ;;  %vm1646_vm1 = vcmp.eq.f32.partialorder %v1637_v13, inf }
 0xb14   :  { %v1649_v43 = vand.u32 2147483648, %v1637_v13  ;;  %vm1648_vm2 = vcmp.eq.f32.partialorder %v1637_v13, 0.0  ;;  %v1664_v8 = vsub.f32 %v3514_v0, %v3528_v18  ;;  %v1716_v0 = vld [vmem:[#allocation16 + $0xa8] sm:$0xff] }
 0xb15   :  { %v1634_v28 = vsub.f32 %v1630_v14, %v1632_v24 }
 0xb17   :  { %v1636_v30 = vmax.f32 %v1634_v28, 0.0  ;;  %v1698_v28 = vld [vmem:[#allocation16 + $0x18] sm:$0xff] }
 0xb19   :  { %v2337_v31 = vpop.eup %2336  ;;  %v1638_v33 = vmul.f32 1.032258, %v1636_v30  ;;  %v1957_v30 = vld [vmem:[%s3690_s15 + $0x70] sm:$0xff] }
 0xb1a   :  { %v1640_v32 = vmul.f32 %v2337_v31, %v1637_v13  ;;  %1980 = vmatpush.msra.mxu0 %v1957_v30  ;;  %v1959_v30 = vld [vmem:[%s3690_s15 + $0x80] sm:$0xff] }
 0xb1b   :  { %2338 = vrsqrt.f32 %v1638_v33  ;;  %vm1658_vm3 = vcmp.eq.f32.partialorder %v1638_v33, inf  ;;  %v1661_v52 = vand.u32 2147483648, %v1638_v33  ;;  %vm1660_vm4 = vcmp.eq.f32.partialorder %v1638_v33, 0.0 }
 0xb1c   :  { %v1641_v45 = vmul.f32 %v2337_v31, %v1640_v32  ;;  %v1955_v32 = vld [vmem:[%s3690_s15 + $0x60] sm:$0xff] }
 0xb1e   :  { %v1642_v25 = vmul.f32 0.5, %v1641_v45  ;;  %v1953_v45 = vld [vmem:[%s3690_s15 + $0x50] sm:$0xff] }
 0xb20   :  { %v1643_v34 = vsub.f32 1.5, %v1642_v25  ;;  %v3566_v25 = vld [vmem:[%s3689_s14] sm:$0x3f] }
 0xb21   :  { %v2339_v37 = vpop.eup %2338 }
 0xb22   :  { %v1644_v39 = vmul.f32 %v2337_v31, %v1643_v34  ;;  %v1652_v40 = vmul.f32 %v2339_v37, %v1638_v33  ;;  %v1956_v31 = vld [vmem:[%s3690_s15 + $0x68] sm:$0xff] }
 0xb23   :  { %1981 = vmatpush.msra.mxu0 %v1956_v31  ;;  %v1952_v34 = vld [vmem:[%s3690_s15 + $0x48] sm:$0xff] }
 0xb24   :  { %v1645_v41 = vmul.f32 %v1644_v39, %v1637_v13  ;;  %v1653_v44 = vmul.f32 %v2339_v37, %v1652_v40  ;;  %v1721_v39 = vperm.slane %v3566_v25, 0  ;;  %v1950_v40 = vld [vmem:[%s3690_s15 + $0x38] sm:$0xff] }
 0xb25   :  { %1982 = vmatpush.msra.mxu0 %v1955_v32 }
 0xb26   :  { %v1647_v46 = vsel %vm1646_vm1, %v1637_v13, %v1645_v41  ;;  %v1654_v36 = vmul.f32 0.5, %v1653_v44  ;;  %v1974_v41 = vld [vmem:[%s3690_s15 + $0xf8] sm:$0xff]  ;;  %v1949_v44 = vld [vmem:[%s3690_s15 + $0x30] sm:$0xff] }
 0xb27   :  { %v1650_v57 = vsel %vm1648_vm2, %v1649_v43, %v1647_v46  ;;  %v1973_v46 = vld [vmem:[%s3690_s15 + $0xf0] sm:$0xff] }
 0xb28   :  { %v1665_v49 = vadd.f32 0.001, %v1650_v57  ;;  %v1655_v50 = vsub.f32 1.5, %v1654_v36  ;;  %v1948_v36 = vld [vmem:[%s3690_s15 + $0x28] sm:$0xff] }
 0xb2a   :  { %2340 = vrcp.f32 %v1665_v49  ;;  %v1656_v47 = vmul.f32 %v2339_v37, %v1655_v50  ;;  %v1951_v37 = vld [vmem:[%s3690_s15 + $0x40] sm:$0xff]  ;;  %v1972_v49 = vld [vmem:[%s3690_s15 + $0xe8] sm:$0xff] }
 0xb2c   :  { %v1657_v51 = vmul.f32 %v1656_v47, %v1638_v33  ;;  %v1723_v47 = vperm.slane %v3566_v25, 2 }
 0xb2e   :  { %v1659_v54 = vsel %vm1658_vm3, %v1638_v33, %v1657_v51  ;;  %v1954_v33 = vld [vmem:[%s3690_s15 + $0x58] sm:$0xff]  ;;  %v1726_v51 = vperm.slane %v3566_v25, 5 }
 0xb2f   :  { %v1662_v60 = vsel %vm1660_vm4, %v1661_v52, %v1659_v54  ;;  %1983 = vmatpush.msra.mxu0 %v1954_v33  ;;  %v1947_v52 = vld [vmem:[%s3690_s15 + $0x20] sm:$0xff] }
 0xb30   :  { %v2341_v48 = vpop.eup %2340  ;;  %v1666_v59 = vadd.f32 0.001, %v1662_v60 }
 0xb31   :  { %v1669_v62 = vmul.f32 %v2341_v48, %v1663_v53  ;;  %1984 = vmatpush.msra.mxu0 %v1953_v45 }
 0xb32   :  { %2342 = vrcp.f32 %v1666_v59  ;;  %v1945_v59 = vld [vmem:[%s3690_s15 + $0x10] sm:$0xff] }
 0xb33   :  { %v1674_v3 = vmul.f32 %v2273_v61, %v1669_v62  ;;  %1985 = vmatpush.msra.mxu0 %v1952_v34  ;;  %v1969_v62 = vld [vmem:[%s3690_s15 + $0xd0] sm:$0xff] }
 0xb35   :  { %v1679_v6 = vadd.f32 %v2274_v63, %v1674_v3  ;;  %1986 = vmatpush.msra.mxu0 %v1951_v37  ;;  %v1968_v3 = vld [vmem:[%s3690_s15 + $0xc8] sm:$0xff]  ;;  %v2035_v37 = vld [vmem:[#allocation19 + $0x78] sm:$0xff] }
 0xb37   :  { %v1681_v7 = vsel %vm282_vm0, %v1679_v6, -inf  ;;  %1987 = vmatpush.msra.mxu0 %v1950_v40  ;;  %v1967_v6 = vld [vmem:[%s3690_s15 + $0xc0] sm:$0xff] }
 0xb38   :  { %v1682_v9 = vrot.slane %v1681_v7, 4  ;;  %v2343_v10 = vpop.eup %2342 }
 0xb39   :  { %v1670_v11 = vmul.f32 %v2343_v10, %v1664_v8  ;;  %1988 = vmatpush.msra.mxu0 %v1949_v44 }
 0xb3a   :  { %v1683_v13 = vmax.f32 %v1681_v7, %v1682_v9  ;;  %v1724_v9 = vperm.slane %v3566_v25, 3 }
 0xb3b   :  { %v1675_v12 = vmul.f32 %v2273_v61, %v1670_v11  ;;  %1989 = vmatpush.msra.mxu0 %v1948_v36  ;;  %v1971_v61 = vld [vmem:[%s3690_s15 + $0xe0] sm:$0xff]  ;;  %v1966_v11 = vld [vmem:[%s3690_s15 + $0xb8] sm:$0xff] }
 0xb3c   :  { %v1684_v16 = vrot.slane %v1683_v13, 2 }
 0xb3d   :  { %v1680_v15 = vadd.f32 %v2274_v63, %v1675_v12  ;;  %1990 = vmatpush.msra.mxu0 %v1947_v52  ;;  %v1725_v52 = vperm.slane %v3566_v25, 4 }
 0xb3e   :  { %v1685_v20 = vmax.f32 %v1683_v13, %v1684_v16  ;;  %v1965_v13 = vld [vmem:[%s3690_s15 + $0xb0] sm:$0xff] }
 0xb3f   :  { %v1688_v17 = vsel %vm282_vm0, %v1680_v15, -inf  ;;  %1991 = vmatpush.msra.mxu0 %v1946_v55  ;;  %v1964_v15 = vld [vmem:[%s3690_s15 + $0xa8] sm:$0xff] }
 0xb40   :  { %v1689_v19 = vrot.slane %v1688_v17, 4  ;;  %v1686_v5 = vrot.slane %v1685_v20, 1 }
 0xb41   :  { %1992 = vmatpush.msra.mxu0 %v1945_v59 }
 0xb42   :  { %v1690_v22 = vmax.f32 %v1688_v17, %v1689_v19  ;;  %v1687_v14 = vmax.f32 %v1685_v20, %v1686_v5  ;;  %v1722_v17 = vperm.slane %v3566_v25, 1  ;;  %v1963_v19 = vld [vmem:[%s3690_s15 + $0xa0] sm:$0xff]  ;;  %v1962_v5 = vld [vmem:[%s3690_s15 + $0x98] sm:$0xff] }
 0xb43   :  { %1993 = vmatpush.msra.mxu0 %v1944_v2 }
 0xb44   :  { %v1691_v23 = vrot.slane %v1690_v22, 2 }
 0xb45   :  { %1994 = vmatpush.msra.mxu0 %v1943_v4 }
 0xb46   :  { %v1692_v21 = vmax.f32 %v1690_v22, %v1691_v23 }
 0xb48   :  { %v1693_v24 = vrot.slane %v1692_v21, 1 }
 0xb4a   :  { %v1694_v26 = vmax.f32 %v1692_v21, %v1693_v24 }
 0xb4c   :  { %v1736_v18 = vsel %vm1735_vm5, %v1694_v26, %v1687_v14  ;;  %v1961_v26 = vld [vmem:[%s3690_s15 + $0x90] sm:$0xff] }
 0xb4d   :  { %2233 = vmatmul.msk.f32.vlgmr.msra.gmra.mxu1 %vm282_vm0, %v1736_v18  ;;  %2235 = vmatmul.msk.f32.vlgmr.msrb.gmra.mxu2 %vm282_vm0, %v1736_v18 }
 0xb4e   :  { %2238 = vmatmul.msk.f32.vlgmr.msrb.gmra.mxu3 %vm282_vm0, %v1736_v18  ;;  %1811 = vmatpush.msra.mxu1 %v1716_v0 }
 0xb4f   :  { %2040 = vmatpush.msrb.mxu2 %v2035_v37  ;;  %v2072_v37 = vld [vmem:[#allocation20 + $0x58] sm:$0xff] }
 0xb50   :  { %1812 = vmatpush.msra.mxu1 %v1710_v27  ;;  %v1960_v27 = vld [vmem:[%s3690_s15 + $0x88] sm:$0xff] }
 0xb52   :  { %1813 = vmatpush.msra.mxu1 %v1704_v38 }
 0xb54   :  { %1814 = vmatpush.msra.mxu1 %v1698_v28 }
 0xb55   :  { %2234 = vmatmul.msk.f32.vlgmr.msrb.gmra.mxu1 %vm282_vm0, %v1736_v18  ;;  %2237 = vmatmul.msk.f32.vlgmr.msra.gmra.mxu2 %vm282_vm0, %v1736_v18 }
 0xb56   :  { %1999 = vmatpush.msrb.mxu1 %v1974_v41 }
 0xb58   :  { %2000 = vmatpush.msrb.mxu1 %v1973_v46 }
 0xb5a   :  { %2001 = vmatpush.msrb.mxu1 %v1972_v49 }
 0xb5c   :  { %2002 = vmatpush.msrb.mxu1 %v1971_v61 }
 0xb5d   :  { %2236 = vmatmul.msk.f32.vlgmr.msra.gmra.mxu1 %vm282_vm0, %v1736_v18 }
 0xb5e   :  { %2003 = vmatpush.msrb.mxu1 %v1970_v56 }
 0xb60   :  { %2004 = vmatpush.msrb.mxu1 %v1969_v62 }
 0xb62   :  { %2005 = vmatpush.msrb.mxu1 %v1968_v3 }
 0xb64   :  { %2006 = vmatpush.msrb.mxu1 %v1967_v6 }
 0xb66   :  { %2007 = vmatpush.msrb.mxu1 %v1966_v11 }
 0xb68   :  { %2008 = vmatpush.msrb.mxu1 %v1965_v13 }
 0xb6a   :  { %2009 = vmatpush.msrb.mxu1 %v1964_v15 }
 0xb6c   :  { %2010 = vmatpush.msrb.mxu1 %v1963_v19 }
 0xb6e   :  { %2011 = vmatpush.msrb.mxu1 %v1962_v5 }
 0xb70   :  { %2012 = vmatpush.msrb.mxu1 %v1961_v26  ;;  %v2028_v26 = vld [vmem:[#allocation19 + $0x40] sm:$0xff] }
 0xb72   :  { %2013 = vmatpush.msrb.mxu1 %v1960_v27  ;;  %v2025_v27 = vld [vmem:[#allocation19 + $0x28] sm:$0xff] }
 0xb74   :  { %2014 = vmatpush.msrb.mxu1 %v1959_v30  ;;  %v2021_v30 = vld [vmem:[#allocation19 + $0x8] sm:$0xff] }
 0xbca   :  { %v1756_v43 = vpop.f32.mrf.mxu1 }
 0xbcb   :  { %v1757_v57 = vadd.f32 %v1756_v43, %v1721_v39  ;;  %v2034_v39 = vld [vmem:[#allocation19 + $0x70] sm:$0xff] }
 0xbcc   :  { %2041 = vmatpush.msrb.mxu2 %v2034_v39  ;;  %v2071_v39 = vld [vmem:[#allocation20 + $0x50] sm:$0xff] }
 0xbcd   :  { %v1859_v50 = vsub.f32 0.0, %v1757_v57  ;;  %v2033_v57 = vld [vmem:[#allocation19 + $0x68] sm:$0xff] }
 0xbce   :  { %2042 = vmatpush.msrb.mxu2 %v2033_v57  ;;  %v2065_v57 = vld [vmem:[#allocation20 + $0x20] sm:$0xff] }
 0xbcf   :  { %v1860_v53 = vmul.f32 1.442695, %v1859_v50 }
 0xbd0   :  { %v1796_v54 = vpop.f32.mrf.mxu2 }
 0xbd1   :  { %2344 = vpow2.f32 %v1860_v53  ;;  %v1797_v35 = vadd.f32 %v1796_v54, %v1723_v47  ;;  %v1856_v48 = vpop.f32.mrf.mxu3  ;;  %v2032_v47 = vld [vmem:[#allocation19 + $0x60] sm:$0xff]  ;;  %v2031_v53 = vld [vmem:[#allocation19 + $0x58] sm:$0xff] }
 0xbd2   :  { %v1857_v60 = vadd.f32 %v1856_v48, %v1726_v51  ;;  %v1776_v42 = vpop.f32.mrf.mxu1  ;;  %2043 = vmatpush.msrb.mxu2 %v2032_v47 }
 0xbd3   :  { %v1879_v63 = vsub.f32 0.0, %v1797_v35  ;;  %v1777_v14 = vadd.f32 %v1776_v42, %v1722_v17 }
 0xbd4   :  { %v1918_v1 = vsub.f32 0.0, %v1857_v60  ;;  %2044 = vmatpush.msrb.mxu2 %v2031_v53  ;;  %v2063_v53 = vld [vmem:[#allocation20 + $0x10] sm:$0xff] }
 0xbd5   :  { %v1880_v58 = vmul.f32 1.442695, %v1879_v63 }
 0xbd6   :  { %v1919_v8 = vmul.f32 1.442695, %v1918_v1 }
 0xbd7   :  { %v2345_v7 = vpop.eup %2344  ;;  %2346 = vpow2.f32 %v1880_v58 }
 0xbd8   :  { %v1862_v10 = vadd.f32 1.0, %v2345_v7  ;;  %v1836_v55 = vpop.f32.mrf.mxu2 }
 0xbd9   :  { %v1837_v59 = vadd.f32 %v1836_v55, %v1725_v52  ;;  %v2061_v55 = vld [vmem:[#allocation20] sm:$0xff] }
 0xbda   :  { %2348 = vrcp.f32 %v1862_v10  ;;  %v1816_v12 = vpop.f32.mrf.mxu1  ;;  %v1874_v29 = vand.u32 2147483648, %v1862_v10  ;;  %v1872_v32 = vand.u32 2147483647, %v1862_v10  ;;  %vm1868_vm6 = vweird.f32 %v1862_v10 }
 0xbdb   :  { %2350 = vpow2.f32 %v1919_v8  ;;  %v1817_v16 = vadd.f32 %v1816_v12, %v1724_v9 }
 0xbdc   :  { %v1875_v41 = vor.u32 1.1754944e-38, %v1874_v29  ;;  %vm1873_vm8 = vcmp.eq.f32.partialorder %v1872_v32, 8.507059e+37  ;;  %v2022_v29 = vld [vmem:[#allocation19 + $0x10] sm:$0xff]  ;;  %v2076_v32 = vld [vmem:[#allocation20 + $0x78] sm:$0xff] }
 0xbdd   :  { %v2347_v20 = vpop.eup %2346  ;;  %v1898_v22 = vsub.f32 0.0, %v1817_v16  ;;  %2081 = vmatpush.msra.mxu3 %v2076_v32 }
 0xbde   :  { %v3639_v23 = vadd.f32 1.0, %v2347_v20 }
 0xbdf   :  { %v1899_v21 = vmul.f32 1.442695, %v1898_v22 }
 0xbe0   :  { %v2349_v24 = vpop.eup %2348  ;;  %2352 = vrcp.f32 %v3639_v23  ;;  %v1894_v61 = vand.u32 2147483648, %v3639_v23  ;;  %vm1888_vm10 = vweird.f32 %v3639_v23  ;;  %v1892_v35 = vand.u32 2147483647, %v3639_v23 }
 0xbe1   :  { %v2351_v0 = vpop.eup %2350  ;;  %v1864_v18 = vmul.f32 %v2349_v24, %v1862_v10  ;;  %2354 = vpow2.f32 %v1899_v21  ;;  %vm1869_vm0 = vweird.f32 %v2349_v24 }
 0xbe2   :  { %v3651_v28 = vadd.f32 1.0, %v2351_v0  ;;  %2356 = vtanh.f32 %v1777_v14  ;;  %vm1870_vm7 = vmor %vm1868_vm6, %vm1869_vm0  ;;  %v1895_v62 = vor.u32 1.1754944e-38, %v1894_v61  ;;  %vm1893_vm12 = vcmp.eq.f32.partialorder %v1892_v35, 8.507059e+37  ;;  %v2029_v14 = vld [vmem:[#allocation19 + $0x48] sm:$0xff]  ;;  %v2027_v0 = vld [vmem:[#allocation19 + $0x38] sm:$0xff] }
 0xbe3   :  { %v1865_v38 = vsub.f32 1.0, %v1864_v18  ;;  %v2026_v18 = vld [vmem:[#allocation19 + $0x30] sm:$0xff] }
 0xbe4   :  { %2358 = vrcp.f32 %v3651_v28  ;;  %v1933_v17 = vand.u32 2147483648, %v3651_v28  ;;  %vm1927_vm3 = vweird.f32 %v3651_v28  ;;  %v1931_v19 = vand.u32 2147483647, %v3651_v28 }
 0xbe5   :  { %v1866_v31 = vmul.f32 %v2349_v24, %v1865_v38  ;;  %v2024_v38 = vld [vmem:[#allocation19 + $0x20] sm:$0xff] }
 0xbe6   :  { %v2353_v33 = vpop.eup %2352  ;;  %v1934_v22 = vor.u32 1.1754944e-38, %v1933_v17  ;;  %vm1932_vm5 = vcmp.eq.f32.partialorder %v1931_v19, 8.507059e+37 }
 0xbe7   :  { %v1884_v45 = vmul.f32 %v2353_v33, %v3639_v23  ;;  %v1867_v34 = vadd.f32 %v2349_v24, %v1866_v31  ;;  %v2355_v40 = vpop.eup %2354  ;;  %vm1889_vm9 = vweird.f32 %v2353_v33  ;;  %v2020_v31 = vld [vmem:[#allocation19] sm:$0xff] }
 0xbe8   :  { %v1901_v46 = vadd.f32 1.0, %v2355_v40  ;;  %v2357_v36 = vpop.eup %2356  ;;  %vm1890_vm11 = vmor %vm1888_vm10, %vm1889_vm9  ;;  %v2070_v40 = vld [vmem:[#allocation20 + $0x48] sm:$0xff] }
 0xbe9   :  { %v1885_v43 = vsub.f32 1.0, %v1884_v45  ;;  %v1871_v44 = vsel %vm1870_vm7, %v2349_v24, %v1867_v34  ;;  %v2030_v24 = vld [vmem:[#allocation19 + $0x50] sm:$0xff]  ;;  %v2074_v45 = vld [vmem:[#allocation20 + $0x68] sm:$0xff]  ;;  %v2073_v34 = vld [vmem:[#allocation20 + $0x60] sm:$0xff] }
 0xbea   :  { %v1876_v49 = vsel %vm1873_vm8, %v1875_v41, %v1871_v44  ;;  %2360 = vrcp.f32 %v1901_v46  ;;  %v2359_v54 = vpop.eup %2358  ;;  %v1913_v4 = vand.u32 2147483648, %v1901_v46  ;;  %v1911_v7 = vand.u32 2147483647, %v1901_v46  ;;  %2045 = vmatpush.msrb.mxu2 %v2030_v24  ;;  %v2069_v41 = vld [vmem:[#allocation20 + $0x40] sm:$0xff]  ;;  %v2067_v44 = vld [vmem:[#allocation20 + $0x30] sm:$0xff] }
 0xbeb   :  { %v1937_v50 = vmul.f32 %v2357_v36, %v1876_v49  ;;  %v1886_v51 = vmul.f32 %v2353_v33, %v1885_v43  ;;  %v1923_v42 = vmul.f32 %v2359_v54, %v3651_v28  ;;  %vm1907_vm14 = vweird.f32 %v1901_v46  ;;  %v2023_v28 = vld [vmem:[#allocation19 + $0x18] sm:$0xff] }
 0xbec   :  { %v1914_v9 = vor.u32 1.1754944e-38, %v1913_v4  ;;  %vm1912_vm1 = vcmp.eq.f32.partialorder %v1911_v7, 8.507059e+37  ;;  %vm1928_vm2 = vweird.f32 %v2359_v54  ;;  %2046 = vmatpush.msrb.mxu2 %v2029_v14  ;;  %v2068_v43 = vld [vmem:[#allocation20 + $0x38] sm:$0xff] }
 0xbed   :  { %2362 = vtanh.f32 %v1937_v50  ;;  %v1887_v56 = vadd.f32 %v2353_v33, %v1886_v51  ;;  %v1924_v58 = vsub.f32 1.0, %v1923_v42  ;;  %vm1929_vm4 = vmor %vm1927_vm3, %vm1928_vm2  ;;  %v2275_v36 = vld [vmem:[#allocation17] ss:$0 sm:$0xff]  ;;  %v2277_v42 = vld [vmem:[%s3695_s20] ss:$0 sm:$0xff] }
 0xbee   :  { %2364 = vtanh.f32 %v1837_v59  ;;  %2047 = vmatpush.msrb.mxu2 %v2028_v26  ;;  %v2064_v49 = vld [vmem:[#allocation20 + $0x18] sm:$0xff] }
 0xbef   :  { %v1891_v48 = vsel %vm1890_vm11, %v2353_v33, %v1887_v56  ;;  %v1925_v10 = vmul.f32 %v2359_v54, %v1924_v58  ;;  %v2075_v33 = vld [vmem:[#allocation20 + $0x70] sm:$0xff]  ;;  %v2276_v56 = vld [vmem:[%s3693_s18] ss:$0 sm:$0xff] }
 0xbf0   :  { %v2361_v60 = vpop.eup %2360  ;;  %v1896_v1 = vsel %vm1893_vm12, %v1895_v62, %v1891_v48  ;;  %2048 = vmatpush.msrb.mxu2 %v2027_v0  ;;  %2082 = vmatpush.msra.mxu3 %v2075_v33 }
 0xbf1   :  { %v1903_v25 = vmul.f32 %v2361_v60, %v1901_v46  ;;  %vm1908_vm13 = vweird.f32 %v2361_v60  ;;  %v1926_v16 = vadd.f32 %v2359_v54, %v1925_v10  ;;  %v2066_v46 = vld [vmem:[#allocation20 + $0x28] sm:$0xff] }
 0xbf2   :  { %vm1909_vm15 = vmor %vm1907_vm14, %vm1908_vm13  ;;  %2049 = vmatpush.msrb.mxu2 %v2026_v18  ;;  %2083 = vmatpush.msra.mxu3 %v2074_v45 }
 0xbf3   :  { %v2363_v63 = vpop.eup %2362  ;;  %v1904_v2 = vsub.f32 1.0, %v1903_v25  ;;  %v1930_v20 = vsel %vm1929_vm4, %v2359_v54, %v1926_v16  ;;  %v2062_v54 = vld [vmem:[#allocation20 + $0x8] sm:$0xff] }
 0xbf4   :  { %v1939_v3 = vmul.f32 %v2363_v63, %v1896_v1  ;;  %v2365_v13 = vpop.eup %2364  ;;  %v1935_v5 = vsel %vm1932_vm5, %v1934_v22, %v1930_v20  ;;  %2050 = vmatpush.msrb.mxu2 %v2025_v27  ;;  %2084 = vmatpush.msra.mxu3 %v2073_v34 }
 0xbf5   :  { %v1905_v6 = vmul.f32 %v2361_v60, %v1904_v2 }
 0xbf6   :  { %1995 = vmatmul.f32.vlgmr.msra.gmra.mxu0 %v1939_v3  ;;  %2051 = vmatpush.msrb.mxu2 %v2024_v38 }
 0xbf7   :  { %v1906_v8 = vadd.f32 %v2361_v60, %v1905_v6  ;;  %2085 = vmatpush.msra.mxu3 %v2072_v37 }
 0xbf8   :  { %2052 = vmatpush.msrb.mxu2 %v2023_v28 }
 0xbf9   :  { %v1910_v11 = vsel %vm1909_vm15, %v2361_v60, %v1906_v8  ;;  %2086 = vmatpush.msra.mxu3 %v2071_v39 }
 0xbfa   :  { %v1915_v12 = vsel %vm1912_vm1, %v1914_v9, %v1910_v11  ;;  %2053 = vmatpush.msrb.mxu2 %v2022_v29 }
 0xbfb   :  { %v1940_v15 = vmul.f32 %v2365_v13, %v1915_v12  ;;  %2087 = vmatpush.msra.mxu3 %v2070_v40 }
 0xbfc   :  { %2054 = vmatpush.msrb.mxu2 %v2021_v30 }
 0xbfd   :  { %2366 = vtanh.f32 %v1940_v15  ;;  %2088 = vmatpush.msra.mxu3 %v2069_v41 }
 0xbfe   :  { %2055 = vmatpush.msrb.mxu2 %v2020_v31 }
 0xbff   :  { %2089 = vmatpush.msra.mxu3 %v2068_v43 }
 0xc01   :  { %2090 = vmatpush.msra.mxu3 %v2067_v44 }
 0xc03   :  { %v2367_v23 = vpop.eup %2366  ;;  %2091 = vmatpush.msra.mxu3 %v2066_v46 }
 0xc04   :  { %v1942_v21 = vmul.f32 %v2367_v23, %v1935_v5 }
 0xc05   :  { %2092 = vmatpush.msra.mxu3 %v2065_v57 }
 0xc06   :  { %2015 = vmatmul.f32.vlgmr.msrb.gmra.mxu1 %v1942_v21 }
 0xc07   :  { %2093 = vmatpush.msra.mxu3 %v2064_v49 }
 0xc09   :  { %2094 = vmatpush.msra.mxu3 %v2063_v53 }
 0xc0b   :  { %2095 = vmatpush.msra.mxu3 %v2062_v54 }
 0xc0d   :  { %2096 = vmatpush.msra.mxu3 %v2061_v55 }
 0xc73   :  { %v1996_v50 = vpop.f32.mrf.mxu0 }
 0xc74   :  { %v1997_v47 = vadd.f32 %v2275_v36, %v1996_v50 }
 0xc83   :  { %v2016_v51 = vpop.f32.mrf.mxu1 }
 0xc84   :  { %v2017_v52 = vadd.f32 %v2016_v51, %v1997_v47 }
 0xc86   :  { %v2019_v61 = vmax.f32 %v2017_v52, 0.0 }
 0xc88   :  { %2056 = vmatmul.f32.vlgmr.msrb.gmra.mxu2 %v2019_v61 }
 0xd0b   :  { %v2057_v35 = vpop.f32.mrf.mxu2 }
 0xd0c   :  { %v2058_v48 = vadd.f32 %v2276_v56, %v2057_v35 }
 0xd0e   :  { %v2060_v60 = vmax.f32 %v2058_v48, 0.0 }
 0xd10   :  { %2097 = vmatmul.f32.vlgmr.msra.gmra.mxu3 %v2060_v60 }
 0xd93   :  { %v2098_v59 = vpop.f32.mrf.mxu3 }
 0xd94   :  { %v2099_v62 = vadd.f32 %v2277_v42, %v2098_v59 }
 0xd96   :  { %2101 = vst [vmem:[#allocation22] sm:$0x3] %v2099_v62 }
 0xd97   :  { %2112 = dma.vmem_to_hbm [thread:$0]  %s2108_s24, 32, %s2110_s30, [#allocation4]  }
 0xd98   :  { %2694 = dma.done.wait [#allocation4], 32  }
 0xd99   :  { %2695 = vsyncadd [#allocation4], 4294967264 }
 0xd9a   :  { %2117 = vsyncpa [#allocation3], 1 }
 0xd9b   :  { %2118 = vsyncpa [#allocation6], 1 }
 0xd9c   :  { %2119 = vsyncpa [#allocation9], 1 }
 0xd9d   :  { %2120 = vsyncpa [#allocation12], 1 }
 0xd9e   :  { %2121 = vsyncpa [#allocation15], 1 }
 0xd9f   :  { %2122 = vsyncpa [#allocation18], 1 }
 0xda0   :  { %2123 = vsyncpa [#allocation21], 1 }
 0xda1   :  { %2124 = vsyncpa [#allocation4], 1 }

</bundles_post_ra>
